<compile_context>
chip_gen: v5e
topology: v5e:2x2
jax: 0.10.0
libtpu: 0.0.40
codegen_flags: <defaults>
</compile_context>

<pallas_src>
import functools

import jax
import jax.numpy as jnp
from jax import lax
from jax.experimental import pallas as pl
from jax.experimental.pallas import tpu as pltpu


# ----------------------------- kernels ------------------------------------ #

def _dws_kernel(x_ref, wdw_ref, wpw_ref, bdw_ref, bpw_ref, o_ref, xp_ref,
                *, K, pad):
    """Fused depthwise(KxK, stride=1) + pointwise(1x1) conv, one batch elem.

    x_ref  : (1, C, H, W)          VMEM  un-padded input block
    wdw_ref: (C, K*K)              SMEM  depthwise weights (scalars)
    wpw_ref: (Cout, C)             SMEM  pointwise weights (scalars)
    bdw_ref: (C,)                  SMEM  depthwise bias
    bpw_ref: (Cout,)               SMEM  pointwise bias
    o_ref  : (1, Cout, Ho, Wo)     VMEM  output block (W on the lane axis)
    xp_ref : (C, H+2p, W+2p) f32   VMEM  zero-padded halo scratch
    """
    C = x_ref.shape[1]
    H, W = x_ref.shape[2], x_ref.shape[3]
    Cout, Ho, Wo = o_ref.shape[1], o_ref.shape[2], o_ref.shape[3]

    # Fused zero padding: build the halo'd input in VMEM (no extra HBM pass).
    xp_ref[...] = jnp.zeros_like(xp_ref)
    xp_ref[:, pad:pad + H, pad:pad + W] = x_ref[0].astype(jnp.float32)

    # Depthwise KxK: one channel plane at a time, W stays on the 128-lane
    # axis; each tap is a scalar(SMEM) x vector FMA on the VPU.
    dw = []
    for c in range(C):
        xc = xp_ref[c]                                   # (H+2p, W+2p)
        acc = jnp.zeros((Ho, Wo), jnp.float32)
        for kh in range(K):
            for kw in range(K):
                acc = acc + xc[kh:kh + Ho, kw:kw + Wo] * wdw_ref[c, kh * K + kw]
        dw.append(acc + bdw_ref[c])

    # Pointwise 1x1: scalar-broadcast FMAs over the C depthwise planes.
    for co in range(Cout):
        out = jnp.zeros((Ho, Wo), jnp.float32) + bpw_ref[co]
        for c in range(C):
            out = out + dw[c] * wpw_ref[co, c]
        o_ref[0, co] = out.astype(o_ref.dtype)


def _dw_kernel(x_ref, wdw_ref, bdw_ref, o_ref, xp_ref, *, K, pad):
    """Depthwise-only conv (groups == nin == nout), one batch elem."""
    C = x_ref.shape[1]
    H, W = x_ref.shape[2], x_ref.shape[3]
    Ho, Wo = o_ref.shape[2], o_ref.shape[3]

    xp_ref[...] = jnp.zeros_like(xp_ref)
    xp_ref[:, pad:pad + H, pad:pad + W] = x_ref[0].astype(jnp.float32)

    for c in range(C):
        xc = xp_ref[c]
        acc = jnp.zeros((Ho, Wo), jnp.float32)
        for kh in range(K):
            for kw in range(K):
                acc = acc + xc[kh:kh + Ho, kw:kw + Wo] * wdw_ref[c, kh * K + kw]
        o_ref[0, c] = (acc + bdw_ref[c]).astype(o_ref.dtype)


# ----------------------------- wrapper ------------------------------------ #

def dws_conv(x_nchw, w_dw, w_pw=None, b_dw=None, b_pw=None,
             *, padding=1, stride=1):
    """Forward of DWSconv.

    x_nchw : (N, Cin, H, W)          float32, PyTorch NCHW layout
    w_dw   : (Cin, 1, K, K)          torch depthwise weight (groups=Cin)
    w_pw   : (Cout, Cin, 1, 1)|None  torch pointwise weight
    b_dw   : (Cin,)|None             depthwise bias
    b_pw   : (Cout,)|None            pointwise bias
    returns: (N, Cout, Ho, Wo)   (Cout = Cin when w_pw is None)
    """
    if stride != 1:
        raise NotImplementedError("stride != 1 is not supported")  # TODO(synk)

    N, C, H, W = x_nchw.shape
    K = w_dw.shape[-1]
    pad = padding
    Ho = H + 2 * pad - K + 1
    Wo = W + 2 * pad - K + 1

    if w_dw.shape[0] != C or w_dw.shape[1] != 1:
        raise NotImplementedError(
            "depthwise channel multiplier (nout != nin) is not supported")

    wdw2 = w_dw[:, 0, :, :].reshape(C, K * K).astype(jnp.float32)   # (C, K*K)
    bdw = (jnp.zeros((C,), jnp.float32) if b_dw is None
           else b_dw.astype(jnp.float32))

    smem = pl.BlockSpec(memory_space=pltpu.MemorySpace.SMEM)
    cparams = pltpu.CompilerParams(
        dimension_semantics=("parallel",),           # megacore: one image/core
        vmem_limit_bytes=32 * 1024 * 1024)           # fits v5e/v6e/v7x scoped VMEM

    if w_pw is not None:
        Cout = w_pw.shape[0]
        wpw2 = w_pw[:, :, 0, 0].astype(jnp.float32)                 # (Cout, C)
        bpw = (jnp.zeros((Cout,), jnp.float32) if b_pw is None
               else b_pw.astype(jnp.float32))
        out = pl.pallas_call(
            functools.partial(_dws_kernel, K=K, pad=pad),
            out_shape=jax.ShapeDtypeStruct((N, Cout, Ho, Wo), x_nchw.dtype),
            grid=(N,),
            in_specs=[
                pl.BlockSpec((1, C, H, W), lambda n: (n, 0, 0, 0)),
                smem, smem, smem, smem,
            ],
            out_specs=pl.BlockSpec((1, Cout, Ho, Wo), lambda n: (n, 0, 0, 0)),
            scratch_shapes=[
                pltpu.VMEM((C, H + 2 * pad, W + 2 * pad), jnp.float32)],
            compiler_params=cparams,
        )(x_nchw, wdw2, wpw2, bdw, bpw)
    else:
        out = pl.pallas_call(
            functools.partial(_dw_kernel, K=K, pad=pad),
            out_shape=jax.ShapeDtypeStruct((N, C, Ho, Wo), x_nchw.dtype),
            grid=(N,),
            in_specs=[
                pl.BlockSpec((1, C, H, W), lambda n: (n, 0, 0, 0)),
                smem, smem,
            ],
            out_specs=pl.BlockSpec((1, C, Ho, Wo), lambda n: (n, 0, 0, 0)),
            scratch_shapes=[
                pltpu.VMEM((C, H + 2 * pad, W + 2 * pad), jnp.float32)],
            compiler_params=cparams,
        )(x_nchw, wdw2, bdw)

    return out


# --------------------------- pure-JAX reference ---------------------------- #

def _ref(x, w_dw, w_pw=None, b_dw=None, b_pw=None, *, padding=1):
    out = lax.conv_general_dilated(
        x, w_dw, window_strides=(1, 1),
        padding=((padding, padding), (padding, padding)),
        dimension_numbers=("NCHW", "OIHW", "NCHW"),
        feature_group_count=x.shape[1])
    if b_dw is not None:
        out = out + b_dw[None, :, None, None]
    if w_pw is not None:
        out = lax.conv_general_dilated(
            out, w_pw, window_strides=(1, 1), padding="VALID",
            dimension_numbers=("NCHW", "OIHW", "NCHW"))
        if b_pw is not None:
            out = out + b_pw[None, :, None, None]
    return out


# --------------------------------- main ------------------------------------ #

if __name__ == "__main__":
    key = jax.random.PRNGKey(0)
    k_x, k_dw, k_pw, k_bd, k_bp = jax.random.split(key, 5)

    N, nin, nout, H, W, K = 2, 4, 8, 16, 16, 3
    x = jax.random.normal(k_x, (N, nin, H, W), dtype=jnp.float32)
    w_dw = jax.random.normal(k_dw, (nin, 1, K, K), dtype=jnp.float32) * 0.1
    w_pw = jax.random.normal(k_pw, (nout, nin, 1, 1), dtype=jnp.float32) * 0.1
    b_dw = jax.random.normal(k_bd, (nin,), dtype=jnp.float32) * 0.1
    b_pw = jax.random.normal(k_bp, (nout,), dtype=jnp.float32) * 0.1

    # 1) pointwise=True, bias=False (module defaults): DW(3x3, g=nin) + 1x1.
    out = jax.block_until_ready(dws_conv(x, w_dw, w_pw, padding=1))
    ref = _ref(x, w_dw, w_pw, padding=1)
    assert out.shape == (N, nout, H, W)
    assert jnp.allclose(out, ref, atol=1e-4, rtol=1e-4)

    # 2) pointwise=False: pure depthwise conv (nout == nin).
    out = jax.block_until_ready(dws_conv(x, w_dw, padding=1))
    ref = _ref(x, w_dw, padding=1)
    assert out.shape == (N, nin, H, W)
    assert jnp.allclose(out, ref, atol=1e-4, rtol=1e-4)

    # 3) pointwise=True with biases on both convs.
    out = jax.block_until_ready(dws_conv(x, w_dw, w_pw, b_dw, b_pw, padding=1))
    ref = _ref(x, w_dw, w_pw, b_dw, b_pw, padding=1)
    assert jnp.allclose(out, ref, atol=1e-4, rtol=1e-4)

    print("KERNEL_OK")
</pallas_src>

<mosaic_0001>
module attributes {stable_mosaic.version = 11 : i64} {
  func.func @_dws_kernel(%arg0: i32, %arg1: memref<1x4x16x16xf32, #tpu.memory_space<vmem>>, %arg2: memref<4x9xf32, #tpu.memory_space<smem>>, %arg3: memref<8x4xf32, #tpu.memory_space<smem>>, %arg4: memref<4xf32, #tpu.memory_space<smem>>, %arg5: memref<8xf32, #tpu.memory_space<smem>>, %arg6: memref<1x8x16x16xf32, #tpu.memory_space<vmem>>, %arg7: memref<4x18x18xf32, #tpu.memory_space<vmem>>) attributes {dimension_semantics = [#tpu.dimension_semantics<parallel>], iteration_bounds = array<i64: 2>, scalar_prefetch = 0 : i64, scratch_operands = 1 : i64, tpu.core_type = #tpu.core_type<tc>, window_params = [{transform_indices = @transform_0, window_bounds = array<i64: 1, 4, 16, 16>}, {transform_indices = @transform_1, window_bounds = array<i64: 4, 9>}, {transform_indices = @transform_2, window_bounds = array<i64: 8, 4>}, {transform_indices = @transform_3, window_bounds = array<i64: 4>}, {transform_indices = @transform_4, window_bounds = array<i64: 8>}, {transform_indices = @transform_5, window_bounds = array<i64: 1, 8, 16, 16>}]} {
    %cst = arith.constant 0.000000e+00 : f32
    %0 = vector.broadcast %cst : f32 to vector<4x18x18xf32>
    %c0 = arith.constant 0 : index
    %c0_0 = arith.constant 0 : index
    %c0_1 = arith.constant 0 : index
    %1 = vector.load %arg7[%c0, %c0_0, %c0_1] : memref<4x18x18xf32, #tpu.memory_space<vmem>>, vector<4x18x18xf32>
    tpu.vector_store %arg7[%c0, %c0_0, %c0_1], %0 {strides = array<i32>} : memref<4x18x18xf32, #tpu.memory_space<vmem>>, vector<4x18x18xf32>,
    %c0_2 = arith.constant 0 : index
    %c0_3 = arith.constant 0 : index
    %c0_4 = arith.constant 0 : index
    %c0_5 = arith.constant 0 : index
    %2 = vector.load %arg1[%c0_2, %c0_3, %c0_4, %c0_5] : memref<1x4x16x16xf32, #tpu.memory_space<vmem>>, vector<1x4x16x16xf32>
    %3 = vector.shape_cast %2 : vector<1x4x16x16xf32> to vector<4x16x16xf32>
    %c0_6 = arith.constant 0 : index
    %c1 = arith.constant 1 : index
    %c1_7 = arith.constant 1 : index
    %4 = vector.load %arg7[%c0_6, %c1, %c1_7] : memref<4x18x18xf32, #tpu.memory_space<vmem>>, vector<4x16x16xf32>
    tpu.vector_store %arg7[%c0_6, %c1, %c1_7], %3 {strides = array<i32>} : memref<4x18x18xf32, #tpu.memory_space<vmem>>, vector<4x16x16xf32>,
    %c0_8 = arith.constant 0 : index
    %c0_9 = arith.constant 0 : index
    %c0_10 = arith.constant 0 : index
    %5 = vector.load %arg7[%c0_8, %c0_9, %c0_10] : memref<4x18x18xf32, #tpu.memory_space<vmem>>, vector<1x18x18xf32>
    %6 = vector.shape_cast %5 : vector<1x18x18xf32> to vector<18x18xf32>
    %cst_11 = arith.constant 0.000000e+00 : f32
    %7 = vector.broadcast %cst_11 : f32 to vector<16x16xf32>
    %8 = vector.extract_strided_slice %6 {offsets = [0, 0], sizes = [16, 16], strides = [1, 1]} : vector<18x18xf32> to vector<16x16xf32>
    %c0_12 = arith.constant 0 : index
    %c0_13 = arith.constant 0 : index
    %9 = memref.load %arg2[%c0_12, %c0_13] : memref<4x9xf32, #tpu.memory_space<smem>>
    %10 = vector.broadcast %9 : f32 to vector<16x16xf32>
    %11 = arith.mulf %8, %10 : vector<16x16xf32>
    %12 = arith.addf %7, %11 : vector<16x16xf32>
    %13 = vector.extract_strided_slice %6 {offsets = [0, 1], sizes = [16, 16], strides = [1, 1]} : vector<18x18xf32> to vector<16x16xf32>
    %c0_14 = arith.constant 0 : index
    %c1_15 = arith.constant 1 : index
    %14 = memref.load %arg2[%c0_14, %c1_15] : memref<4x9xf32, #tpu.memory_space<smem>>
    %15 = vector.broadcast %14 : f32 to vector<16x16xf32>
    %16 = arith.mulf %13, %15 : vector<16x16xf32>
    %17 = arith.addf %12, %16 : vector<16x16xf32>
    %18 = vector.extract_strided_slice %6 {offsets = [0, 2], sizes = [16, 16], strides = [1, 1]} : vector<18x18xf32> to vector<16x16xf32>
    %c0_16 = arith.constant 0 : index
    %c2 = arith.constant 2 : index
    %19 = memref.load %arg2[%c0_16, %c2] : memref<4x9xf32, #tpu.memory_space<smem>>
    %20 = vector.broadcast %19 : f32 to vector<16x16xf32>
    %21 = arith.mulf %18, %20 : vector<16x16xf32>
    %22 = arith.addf %17, %21 : vector<16x16xf32>
    %23 = vector.extract_strided_slice %6 {offsets = [1, 0], sizes = [16, 16], strides = [1, 1]} : vector<18x18xf32> to vector<16x16xf32>
    %c0_17 = arith.constant 0 : index
    %c3 = arith.constant 3 : index
    %24 = memref.load %arg2[%c0_17, %c3] : memref<4x9xf32, #tpu.memory_space<smem>>
    %25 = vector.broadcast %24 : f32 to vector<16x16xf32>
    %26 = arith.mulf %23, %25 : vector<16x16xf32>
    %27 = arith.addf %22, %26 : vector<16x16xf32>
    %28 = vector.extract_strided_slice %6 {offsets = [1, 1], sizes = [16, 16], strides = [1, 1]} : vector<18x18xf32> to vector<16x16xf32>
    %c0_18 = arith.constant 0 : index
    %c4 = arith.constant 4 : index
    %29 = memref.load %arg2[%c0_18, %c4] : memref<4x9xf32, #tpu.memory_space<smem>>
    %30 = vector.broadcast %29 : f32 to vector<16x16xf32>
    %31 = arith.mulf %28, %30 : vector<16x16xf32>
    %32 = arith.addf %27, %31 : vector<16x16xf32>
    %33 = vector.extract_strided_slice %6 {offsets = [1, 2], sizes = [16, 16], strides = [1, 1]} : vector<18x18xf32> to vector<16x16xf32>
    %c0_19 = arith.constant 0 : index
    %c5 = arith.constant 5 : index
    %34 = memref.load %arg2[%c0_19, %c5] : memref<4x9xf32, #tpu.memory_space<smem>>
    %35 = vector.broadcast %34 : f32 to vector<16x16xf32>
    %36 = arith.mulf %33, %35 : vector<16x16xf32>
    %37 = arith.addf %32, %36 : vector<16x16xf32>
    %38 = vector.extract_strided_slice %6 {offsets = [2, 0], sizes = [16, 16], strides = [1, 1]} : vector<18x18xf32> to vector<16x16xf32>
    %c0_20 = arith.constant 0 : index
    %c6 = arith.constant 6 : index
    %39 = memref.load %arg2[%c0_20, %c6] : memref<4x9xf32, #tpu.memory_space<smem>>
    %40 = vector.broadcast %39 : f32 to vector<16x16xf32>
    %41 = arith.mulf %38, %40 : vector<16x16xf32>
    %42 = arith.addf %37, %41 : vector<16x16xf32>
    %43 = vector.extract_strided_slice %6 {offsets = [2, 1], sizes = [16, 16], strides = [1, 1]} : vector<18x18xf32> to vector<16x16xf32>
    %c0_21 = arith.constant 0 : index
    %c7 = arith.constant 7 : index
    %44 = memref.load %arg2[%c0_21, %c7] : memref<4x9xf32, #tpu.memory_space<smem>>
    %45 = vector.broadcast %44 : f32 to vector<16x16xf32>
    %46 = arith.mulf %43, %45 : vector<16x16xf32>
    %47 = arith.addf %42, %46 : vector<16x16xf32>
    %48 = vector.extract_strided_slice %6 {offsets = [2, 2], sizes = [16, 16], strides = [1, 1]} : vector<18x18xf32> to vector<16x16xf32>
    %c0_22 = arith.constant 0 : index
    %c8 = arith.constant 8 : index
    %49 = memref.load %arg2[%c0_22, %c8] : memref<4x9xf32, #tpu.memory_space<smem>>
    %50 = vector.broadcast %49 : f32 to vector<16x16xf32>
    %51 = arith.mulf %48, %50 : vector<16x16xf32>
    %52 = arith.addf %47, %51 : vector<16x16xf32>
    %c0_23 = arith.constant 0 : index
    %53 = memref.load %arg4[%c0_23] : memref<4xf32, #tpu.memory_space<smem>>
    %54 = vector.broadcast %53 : f32 to vector<16x16xf32>
    %55 = arith.addf %52, %54 : vector<16x16xf32>
    %c1_24 = arith.constant 1 : index
    %c0_25 = arith.constant 0 : index
    %c0_26 = arith.constant 0 : index
    %56 = vector.load %arg7[%c1_24, %c0_25, %c0_26] : memref<4x18x18xf32, #tpu.memory_space<vmem>>, vector<1x18x18xf32>
    %57 = vector.shape_cast %56 : vector<1x18x18xf32> to vector<18x18xf32>
    %cst_27 = arith.constant 0.000000e+00 : f32
    %58 = vector.broadcast %cst_27 : f32 to vector<16x16xf32>
    %59 = vector.extract_strided_slice %57 {offsets = [0, 0], sizes = [16, 16], strides = [1, 1]} : vector<18x18xf32> to vector<16x16xf32>
    %c1_28 = arith.constant 1 : index
    %c0_29 = arith.constant 0 : index
    %60 = memref.load %arg2[%c1_28, %c0_29] : memref<4x9xf32, #tpu.memory_space<smem>>
    %61 = vector.broadcast %60 : f32 to vector<16x16xf32>
    %62 = arith.mulf %59, %61 : vector<16x16xf32>
    %63 = arith.addf %58, %62 : vector<16x16xf32>
    %64 = vector.extract_strided_slice %57 {offsets = [0, 1], sizes = [16, 16], strides = [1, 1]} : vector<18x18xf32> to vector<16x16xf32>
    %c1_30 = arith.constant 1 : index
    %c1_31 = arith.constant 1 : index
    %65 = memref.load %arg2[%c1_30, %c1_31] : memref<4x9xf32, #tpu.memory_space<smem>>
    %66 = vector.broadcast %65 : f32 to vector<16x16xf32>
    %67 = arith.mulf %64, %66 : vector<16x16xf32>
    %68 = arith.addf %63, %67 : vector<16x16xf32>
    %69 = vector.extract_strided_slice %57 {offsets = [0, 2], sizes = [16, 16], strides = [1, 1]} : vector<18x18xf32> to vector<16x16xf32>
    %c1_32 = arith.constant 1 : index
    %c2_33 = arith.constant 2 : index
    %70 = memref.load %arg2[%c1_32, %c2_33] : memref<4x9xf32, #tpu.memory_space<smem>>
    %71 = vector.broadcast %70 : f32 to vector<16x16xf32>
    %72 = arith.mulf %69, %71 : vector<16x16xf32>
    %73 = arith.addf %68, %72 : vector<16x16xf32>
    %74 = vector.extract_strided_slice %57 {offsets = [1, 0], sizes = [16, 16], strides = [1, 1]} : vector<18x18xf32> to vector<16x16xf32>
    %c1_34 = arith.constant 1 : index
    %c3_35 = arith.constant 3 : index
    %75 = memref.load %arg2[%c1_34, %c3_35] : memref<4x9xf32, #tpu.memory_space<smem>>
    %76 = vector.broadcast %75 : f32 to vector<16x16xf32>
    %77 = arith.mulf %74, %76 : vector<16x16xf32>
    %78 = arith.addf %73, %77 : vector<16x16xf32>
    %79 = vector.extract_strided_slice %57 {offsets = [1, 1], sizes = [16, 16], strides = [1, 1]} : vector<18x18xf32> to vector<16x16xf32>
    %c1_36 = arith.constant 1 : index
    %c4_37 = arith.constant 4 : index
    %80 = memref.load %arg2[%c1_36, %c4_37] : memref<4x9xf32, #tpu.memory_space<smem>>
    %81 = vector.broadcast %80 : f32 to vector<16x16xf32>
    %82 = arith.mulf %79, %81 : vector<16x16xf32>
    %83 = arith.addf %78, %82 : vector<16x16xf32>
    %84 = vector.extract_strided_slice %57 {offsets = [1, 2], sizes = [16, 16], strides = [1, 1]} : vector<18x18xf32> to vector<16x16xf32>
    %c1_38 = arith.constant 1 : index
    %c5_39 = arith.constant 5 : index
    %85 = memref.load %arg2[%c1_38, %c5_39] : memref<4x9xf32, #tpu.memory_space<smem>>
    %86 = vector.broadcast %85 : f32 to vector<16x16xf32>
    %87 = arith.mulf %84, %86 : vector<16x16xf32>
    %88 = arith.addf %83, %87 : vector<16x16xf32>
    %89 = vector.extract_strided_slice %57 {offsets = [2, 0], sizes = [16, 16], strides = [1, 1]} : vector<18x18xf32> to vector<16x16xf32>
    %c1_40 = arith.constant 1 : index
    %c6_41 = arith.constant 6 : index
    %90 = memref.load %arg2[%c1_40, %c6_41] : memref<4x9xf32, #tpu.memory_space<smem>>
    %91 = vector.broadcast %90 : f32 to vector<16x16xf32>
    %92 = arith.mulf %89, %91 : vector<16x16xf32>
    %93 = arith.addf %88, %92 : vector<16x16xf32>
    %94 = vector.extract_strided_slice %57 {offsets = [2, 1], sizes = [16, 16], strides = [1, 1]} : vector<18x18xf32> to vector<16x16xf32>
    %c1_42 = arith.constant 1 : index
    %c7_43 = arith.constant 7 : index
    %95 = memref.load %arg2[%c1_42, %c7_43] : memref<4x9xf32, #tpu.memory_space<smem>>
    %96 = vector.broadcast %95 : f32 to vector<16x16xf32>
    %97 = arith.mulf %94, %96 : vector<16x16xf32>
    %98 = arith.addf %93, %97 : vector<16x16xf32>
    %99 = vector.extract_strided_slice %57 {offsets = [2, 2], sizes = [16, 16], strides = [1, 1]} : vector<18x18xf32> to vector<16x16xf32>
    %c1_44 = arith.constant 1 : index
    %c8_45 = arith.constant 8 : index
    %100 = memref.load %arg2[%c1_44, %c8_45] : memref<4x9xf32, #tpu.memory_space<smem>>
    %101 = vector.broadcast %100 : f32 to vector<16x16xf32>
    %102 = arith.mulf %99, %101 : vector<16x16xf32>
    %103 = arith.addf %98, %102 : vector<16x16xf32>
    %c1_46 = arith.constant 1 : index
    %104 = memref.load %arg4[%c1_46] : memref<4xf32, #tpu.memory_space<smem>>
    %105 = vector.broadcast %104 : f32 to vector<16x16xf32>
    %106 = arith.addf %103, %105 : vector<16x16xf32>
    %c2_47 = arith.constant 2 : index
    %c0_48 = arith.constant 0 : index
    %c0_49 = arith.constant 0 : index
    %107 = vector.load %arg7[%c2_47, %c0_48, %c0_49] : memref<4x18x18xf32, #tpu.memory_space<vmem>>, vector<1x18x18xf32>
    %108 = vector.shape_cast %107 : vector<1x18x18xf32> to vector<18x18xf32>
    %cst_50 = arith.constant 0.000000e+00 : f32
    %109 = vector.broadcast %cst_50 : f32 to vector<16x16xf32>
    %110 = vector.extract_strided_slice %108 {offsets = [0, 0], sizes = [16, 16], strides = [1, 1]} : vector<18x18xf32> to vector<16x16xf32>
    %c2_51 = arith.constant 2 : index
    %c0_52 = arith.constant 0 : index
    %111 = memref.load %arg2[%c2_51, %c0_52] : memref<4x9xf32, #tpu.memory_space<smem>>
    %112 = vector.broadcast %111 : f32 to vector<16x16xf32>
    %113 = arith.mulf %110, %112 : vector<16x16xf32>
    %114 = arith.addf %109, %113 : vector<16x16xf32>
    %115 = vector.extract_strided_slice %108 {offsets = [0, 1], sizes = [16, 16], strides = [1, 1]} : vector<18x18xf32> to vector<16x16xf32>
    %c2_53 = arith.constant 2 : index
    %c1_54 = arith.constant 1 : index
    %116 = memref.load %arg2[%c2_53, %c1_54] : memref<4x9xf32, #tpu.memory_space<smem>>
    %117 = vector.broadcast %116 : f32 to vector<16x16xf32>
    %118 = arith.mulf %115, %117 : vector<16x16xf32>
    %119 = arith.addf %114, %118 : vector<16x16xf32>
    %120 = vector.extract_strided_slice %108 {offsets = [0, 2], sizes = [16, 16], strides = [1, 1]} : vector<18x18xf32> to vector<16x16xf32>
    %c2_55 = arith.constant 2 : index
    %c2_56 = arith.constant 2 : index
    %121 = memref.load %arg2[%c2_55, %c2_56] : memref<4x9xf32, #tpu.memory_space<smem>>
    %122 = vector.broadcast %121 : f32 to vector<16x16xf32>
    %123 = arith.mulf %120, %122 : vector<16x16xf32>
    %124 = arith.addf %119, %123 : vector<16x16xf32>
    %125 = vector.extract_strided_slice %108 {offsets = [1, 0], sizes = [16, 16], strides = [1, 1]} : vector<18x18xf32> to vector<16x16xf32>
    %c2_57 = arith.constant 2 : index
    %c3_58 = arith.constant 3 : index
    %126 = memref.load %arg2[%c2_57, %c3_58] : memref<4x9xf32, #tpu.memory_space<smem>>
    %127 = vector.broadcast %126 : f32 to vector<16x16xf32>
    %128 = arith.mulf %125, %127 : vector<16x16xf32>
    %129 = arith.addf %124, %128 : vector<16x16xf32>
    %130 = vector.extract_strided_slice %108 {offsets = [1, 1], sizes = [16, 16], strides = [1, 1]} : vector<18x18xf32> to vector<16x16xf32>
    %c2_59 = arith.constant 2 : index
    %c4_60 = arith.constant 4 : index
    %131 = memref.load %arg2[%c2_59, %c4_60] : memref<4x9xf32, #tpu.memory_space<smem>>
    %132 = vector.broadcast %131 : f32 to vector<16x16xf32>
    %133 = arith.mulf %130, %132 : vector<16x16xf32>
    %134 = arith.addf %129, %133 : vector<16x16xf32>
    %135 = vector.extract_strided_slice %108 {offsets = [1, 2], sizes = [16, 16], strides = [1, 1]} : vector<18x18xf32> to vector<16x16xf32>
    %c2_61 = arith.constant 2 : index
    %c5_62 = arith.constant 5 : index
    %136 = memref.load %arg2[%c2_61, %c5_62] : memref<4x9xf32, #tpu.memory_space<smem>>
    %137 = vector.broadcast %136 : f32 to vector<16x16xf32>
    %138 = arith.mulf %135, %137 : vector<16x16xf32>
    %139 = arith.addf %134, %138 : vector<16x16xf32>
    %140 = vector.extract_strided_slice %108 {offsets = [2, 0], sizes = [16, 16], strides = [1, 1]} : vector<18x18xf32> to vector<16x16xf32>
    %c2_63 = arith.constant 2 : index
    %c6_64 = arith.constant 6 : index
    %141 = memref.load %arg2[%c2_63, %c6_64] : memref<4x9xf32, #tpu.memory_space<smem>>
    %142 = vector.broadcast %141 : f32 to vector<16x16xf32>
    %143 = arith.mulf %140, %142 : vector<16x16xf32>
    %144 = arith.addf %139, %143 : vector<16x16xf32>
    %145 = vector.extract_strided_slice %108 {offsets = [2, 1], sizes = [16, 16], strides = [1, 1]} : vector<18x18xf32> to vector<16x16xf32>
    %c2_65 = arith.constant 2 : index
    %c7_66 = arith.constant 7 : index
    %146 = memref.load %arg2[%c2_65, %c7_66] : memref<4x9xf32, #tpu.memory_space<smem>>
    %147 = vector.broadcast %146 : f32 to vector<16x16xf32>
    %148 = arith.mulf %145, %147 : vector<16x16xf32>
    %149 = arith.addf %144, %148 : vector<16x16xf32>
    %150 = vector.extract_strided_slice %108 {offsets = [2, 2], sizes = [16, 16], strides = [1, 1]} : vector<18x18xf32> to vector<16x16xf32>
    %c2_67 = arith.constant 2 : index
    %c8_68 = arith.constant 8 : index
    %151 = memref.load %arg2[%c2_67, %c8_68] : memref<4x9xf32, #tpu.memory_space<smem>>
    %152 = vector.broadcast %151 : f32 to vector<16x16xf32>
    %153 = arith.mulf %150, %152 : vector<16x16xf32>
    %154 = arith.addf %149, %153 : vector<16x16xf32>
    %c2_69 = arith.constant 2 : index
    %155 = memref.load %arg4[%c2_69] : memref<4xf32, #tpu.memory_space<smem>>
    %156 = vector.broadcast %155 : f32 to vector<16x16xf32>
    %157 = arith.addf %154, %156 : vector<16x16xf32>
    %c3_70 = arith.constant 3 : index
    %c0_71 = arith.constant 0 : index
    %c0_72 = arith.constant 0 : index
    %158 = vector.load %arg7[%c3_70, %c0_71, %c0_72] : memref<4x18x18xf32, #tpu.memory_space<vmem>>, vector<1x18x18xf32>
    %159 = vector.shape_cast %158 : vector<1x18x18xf32> to vector<18x18xf32>
    %cst_73 = arith.constant 0.000000e+00 : f32
    %160 = vector.broadcast %cst_73 : f32 to vector<16x16xf32>
    %161 = vector.extract_strided_slice %159 {offsets = [0, 0], sizes = [16, 16], strides = [1, 1]} : vector<18x18xf32> to vector<16x16xf32>
    %c3_74 = arith.constant 3 : index
    %c0_75 = arith.constant 0 : index
    %162 = memref.load %arg2[%c3_74, %c0_75] : memref<4x9xf32, #tpu.memory_space<smem>>
    %163 = vector.broadcast %162 : f32 to vector<16x16xf32>
    %164 = arith.mulf %161, %163 : vector<16x16xf32>
    %165 = arith.addf %160, %164 : vector<16x16xf32>
    %166 = vector.extract_strided_slice %159 {offsets = [0, 1], sizes = [16, 16], strides = [1, 1]} : vector<18x18xf32> to vector<16x16xf32>
    %c3_76 = arith.constant 3 : index
    %c1_77 = arith.constant 1 : index
    %167 = memref.load %arg2[%c3_76, %c1_77] : memref<4x9xf32, #tpu.memory_space<smem>>
    %168 = vector.broadcast %167 : f32 to vector<16x16xf32>
    %169 = arith.mulf %166, %168 : vector<16x16xf32>
    %170 = arith.addf %165, %169 : vector<16x16xf32>
    %171 = vector.extract_strided_slice %159 {offsets = [0, 2], sizes = [16, 16], strides = [1, 1]} : vector<18x18xf32> to vector<16x16xf32>
    %c3_78 = arith.constant 3 : index
    %c2_79 = arith.constant 2 : index
    %172 = memref.load %arg2[%c3_78, %c2_79] : memref<4x9xf32, #tpu.memory_space<smem>>
    %173 = vector.broadcast %172 : f32 to vector<16x16xf32>
    %174 = arith.mulf %171, %173 : vector<16x16xf32>
    %175 = arith.addf %170, %174 : vector<16x16xf32>
    %176 = vector.extract_strided_slice %159 {offsets = [1, 0], sizes = [16, 16], strides = [1, 1]} : vector<18x18xf32> to vector<16x16xf32>
    %c3_80 = arith.constant 3 : index
    %c3_81 = arith.constant 3 : index
    %177 = memref.load %arg2[%c3_80, %c3_81] : memref<4x9xf32, #tpu.memory_space<smem>>
    %178 = vector.broadcast %177 : f32 to vector<16x16xf32>
    %179 = arith.mulf %176, %178 : vector<16x16xf32>
    %180 = arith.addf %175, %179 : vector<16x16xf32>
    %181 = vector.extract_strided_slice %159 {offsets = [1, 1], sizes = [16, 16], strides = [1, 1]} : vector<18x18xf32> to vector<16x16xf32>
    %c3_82 = arith.constant 3 : index
    %c4_83 = arith.constant 4 : index
    %182 = memref.load %arg2[%c3_82, %c4_83] : memref<4x9xf32, #tpu.memory_space<smem>>
    %183 = vector.broadcast %182 : f32 to vector<16x16xf32>
    %184 = arith.mulf %181, %183 : vector<16x16xf32>
    %185 = arith.addf %180, %184 : vector<16x16xf32>
    %186 = vector.extract_strided_slice %159 {offsets = [1, 2], sizes = [16, 16], strides = [1, 1]} : vector<18x18xf32> to vector<16x16xf32>
    %c3_84 = arith.constant 3 : index
    %c5_85 = arith.constant 5 : index
    %187 = memref.load %arg2[%c3_84, %c5_85] : memref<4x9xf32, #tpu.memory_space<smem>>
    %188 = vector.broadcast %187 : f32 to vector<16x16xf32>
    %189 = arith.mulf %186, %188 : vector<16x16xf32>
    %190 = arith.addf %185, %189 : vector<16x16xf32>
    %191 = vector.extract_strided_slice %159 {offsets = [2, 0], sizes = [16, 16], strides = [1, 1]} : vector<18x18xf32> to vector<16x16xf32>
    %c3_86 = arith.constant 3 : index
    %c6_87 = arith.constant 6 : index
    %192 = memref.load %arg2[%c3_86, %c6_87] : memref<4x9xf32, #tpu.memory_space<smem>>
    %193 = vector.broadcast %192 : f32 to vector<16x16xf32>
    %194 = arith.mulf %191, %193 : vector<16x16xf32>
    %195 = arith.addf %190, %194 : vector<16x16xf32>
    %196 = vector.extract_strided_slice %159 {offsets = [2, 1], sizes = [16, 16], strides = [1, 1]} : vector<18x18xf32> to vector<16x16xf32>
    %c3_88 = arith.constant 3 : index
    %c7_89 = arith.constant 7 : index
    %197 = memref.load %arg2[%c3_88, %c7_89] : memref<4x9xf32, #tpu.memory_space<smem>>
    %198 = vector.broadcast %197 : f32 to vector<16x16xf32>
    %199 = arith.mulf %196, %198 : vector<16x16xf32>
    %200 = arith.addf %195, %199 : vector<16x16xf32>
    %201 = vector.extract_strided_slice %159 {offsets = [2, 2], sizes = [16, 16], strides = [1, 1]} : vector<18x18xf32> to vector<16x16xf32>
    %c3_90 = arith.constant 3 : index
    %c8_91 = arith.constant 8 : index
    %202 = memref.load %arg2[%c3_90, %c8_91] : memref<4x9xf32, #tpu.memory_space<smem>>
    %203 = vector.broadcast %202 : f32 to vector<16x16xf32>
    %204 = arith.mulf %201, %203 : vector<16x16xf32>
    %205 = arith.addf %200, %204 : vector<16x16xf32>
    %c3_92 = arith.constant 3 : index
    %206 = memref.load %arg4[%c3_92] : memref<4xf32, #tpu.memory_space<smem>>
    %207 = vector.broadcast %206 : f32 to vector<16x16xf32>
    %208 = arith.addf %205, %207 : vector<16x16xf32>
    %cst_93 = arith.constant 0.000000e+00 : f32
    %209 = vector.broadcast %cst_93 : f32 to vector<16x16xf32>
    %c0_94 = arith.constant 0 : index
    %210 = memref.load %arg5[%c0_94] : memref<8xf32, #tpu.memory_space<smem>>
    %211 = vector.broadcast %210 : f32 to vector<16x16xf32>
    %212 = arith.addf %209, %211 : vector<16x16xf32>
    %c0_95 = arith.constant 0 : index
    %c0_96 = arith.constant 0 : index
    %213 = memref.load %arg3[%c0_95, %c0_96] : memref<8x4xf32, #tpu.memory_space<smem>>
    %214 = vector.broadcast %213 : f32 to vector<16x16xf32>
    %215 = arith.mulf %55, %214 : vector<16x16xf32>
    %216 = arith.addf %212, %215 : vector<16x16xf32>
    %c0_97 = arith.constant 0 : index
    %c1_98 = arith.constant 1 : index
    %217 = memref.load %arg3[%c0_97, %c1_98] : memref<8x4xf32, #tpu.memory_space<smem>>
    %218 = vector.broadcast %217 : f32 to vector<16x16xf32>
    %219 = arith.mulf %106, %218 : vector<16x16xf32>
    %220 = arith.addf %216, %219 : vector<16x16xf32>
    %c0_99 = arith.constant 0 : index
    %c2_100 = arith.constant 2 : index
    %221 = memref.load %arg3[%c0_99, %c2_100] : memref<8x4xf32, #tpu.memory_space<smem>>
    %222 = vector.broadcast %221 : f32 to vector<16x16xf32>
    %223 = arith.mulf %157, %222 : vector<16x16xf32>
    %224 = arith.addf %220, %223 : vector<16x16xf32>
    %c0_101 = arith.constant 0 : index
    %c3_102 = arith.constant 3 : index
    %225 = memref.load %arg3[%c0_101, %c3_102] : memref<8x4xf32, #tpu.memory_space<smem>>
    %226 = vector.broadcast %225 : f32 to vector<16x16xf32>
    %227 = arith.mulf %208, %226 : vector<16x16xf32>
    %228 = arith.addf %224, %227 : vector<16x16xf32>
    %c0_103 = arith.constant 0 : index
    %c0_104 = arith.constant 0 : index
    %c0_105 = arith.constant 0 : index
    %c0_106 = arith.constant 0 : index
    %229 = vector.load %arg6[%c0_103, %c0_104, %c0_105, %c0_106] : memref<1x8x16x16xf32, #tpu.memory_space<vmem>>, vector<1x1x16x16xf32>
    %230 = vector.shape_cast %229 : vector<1x1x16x16xf32> to vector<16x16xf32>
    %231 = vector.shape_cast %228 : vector<16x16xf32> to vector<1x1x16x16xf32>
    tpu.vector_store %arg6[%c0_103, %c0_104, %c0_105, %c0_106], %231 {strides = array<i32>} : memref<1x8x16x16xf32, #tpu.memory_space<vmem>>, vector<1x1x16x16xf32>,
    %cst_107 = arith.constant 0.000000e+00 : f32
    %232 = vector.broadcast %cst_107 : f32 to vector<16x16xf32>
    %c1_108 = arith.constant 1 : index
    %233 = memref.load %arg5[%c1_108] : memref<8xf32, #tpu.memory_space<smem>>
    %234 = vector.broadcast %233 : f32 to vector<16x16xf32>
    %235 = arith.addf %232, %234 : vector<16x16xf32>
    %c1_109 = arith.constant 1 : index
    %c0_110 = arith.constant 0 : index
    %236 = memref.load %arg3[%c1_109, %c0_110] : memref<8x4xf32, #tpu.memory_space<smem>>
    %237 = vector.broadcast %236 : f32 to vector<16x16xf32>
    %238 = arith.mulf %55, %237 : vector<16x16xf32>
    %239 = arith.addf %235, %238 : vector<16x16xf32>
    %c1_111 = arith.constant 1 : index
    %c1_112 = arith.constant 1 : index
    %240 = memref.load %arg3[%c1_111, %c1_112] : memref<8x4xf32, #tpu.memory_space<smem>>
    %241 = vector.broadcast %240 : f32 to vector<16x16xf32>
    %242 = arith.mulf %106, %241 : vector<16x16xf32>
    %243 = arith.addf %239, %242 : vector<16x16xf32>
    %c1_113 = arith.constant 1 : index
    %c2_114 = arith.constant 2 : index
    %244 = memref.load %arg3[%c1_113, %c2_114] : memref<8x4xf32, #tpu.memory_space<smem>>
    %245 = vector.broadcast %244 : f32 to vector<16x16xf32>
    %246 = arith.mulf %157, %245 : vector<16x16xf32>
    %247 = arith.addf %243, %246 : vector<16x16xf32>
    %c1_115 = arith.constant 1 : index
    %c3_116 = arith.constant 3 : index
    %248 = memref.load %arg3[%c1_115, %c3_116] : memref<8x4xf32, #tpu.memory_space<smem>>
    %249 = vector.broadcast %248 : f32 to vector<16x16xf32>
    %250 = arith.mulf %208, %249 : vector<16x16xf32>
    %251 = arith.addf %247, %250 : vector<16x16xf32>
    %c0_117 = arith.constant 0 : index
    %c1_118 = arith.constant 1 : index
    %c0_119 = arith.constant 0 : index
    %c0_120 = arith.constant 0 : index
    %252 = vector.load %arg6[%c0_117, %c1_118, %c0_119, %c0_120] : memref<1x8x16x16xf32, #tpu.memory_space<vmem>>, vector<1x1x16x16xf32>
    %253 = vector.shape_cast %252 : vector<1x1x16x16xf32> to vector<16x16xf32>
    %254 = vector.shape_cast %251 : vector<16x16xf32> to vector<1x1x16x16xf32>
    tpu.vector_store %arg6[%c0_117, %c1_118, %c0_119, %c0_120], %254 {strides = array<i32>} : memref<1x8x16x16xf32, #tpu.memory_space<vmem>>, vector<1x1x16x16xf32>,
    %cst_121 = arith.constant 0.000000e+00 : f32
    %255 = vector.broadcast %cst_121 : f32 to vector<16x16xf32>
    %c2_122 = arith.constant 2 : index
    %256 = memref.load %arg5[%c2_122] : memref<8xf32, #tpu.memory_space<smem>>
    %257 = vector.broadcast %256 : f32 to vector<16x16xf32>
    %258 = arith.addf %255, %257 : vector<16x16xf32>
    %c2_123 = arith.constant 2 : index
    %c0_124 = arith.constant 0 : index
    %259 = memref.load %arg3[%c2_123, %c0_124] : memref<8x4xf32, #tpu.memory_space<smem>>
    %260 = vector.broadcast %259 : f32 to vector<16x16xf32>
    %261 = arith.mulf %55, %260 : vector<16x16xf32>
    %262 = arith.addf %258, %261 : vector<16x16xf32>
    %c2_125 = arith.constant 2 : index
    %c1_126 = arith.constant 1 : index
    %263 = memref.load %arg3[%c2_125, %c1_126] : memref<8x4xf32, #tpu.memory_space<smem>>
    %264 = vector.broadcast %263 : f32 to vector<16x16xf32>
    %265 = arith.mulf %106, %264 : vector<16x16xf32>
    %266 = arith.addf %262, %265 : vector<16x16xf32>
    %c2_127 = arith.constant 2 : index
    %c2_128 = arith.constant 2 : index
    %267 = memref.load %arg3[%c2_127, %c2_128] : memref<8x4xf32, #tpu.memory_space<smem>>
    %268 = vector.broadcast %267 : f32 to vector<16x16xf32>
    %269 = arith.mulf %157, %268 : vector<16x16xf32>
    %270 = arith.addf %266, %269 : vector<16x16xf32>
    %c2_129 = arith.constant 2 : index
    %c3_130 = arith.constant 3 : index
    %271 = memref.load %arg3[%c2_129, %c3_130] : memref<8x4xf32, #tpu.memory_space<smem>>
    %272 = vector.broadcast %271 : f32 to vector<16x16xf32>
    %273 = arith.mulf %208, %272 : vector<16x16xf32>
    %274 = arith.addf %270, %273 : vector<16x16xf32>
    %c0_131 = arith.constant 0 : index
    %c2_132 = arith.constant 2 : index
    %c0_133 = arith.constant 0 : index
    %c0_134 = arith.constant 0 : index
    %275 = vector.load %arg6[%c0_131, %c2_132, %c0_133, %c0_134] : memref<1x8x16x16xf32, #tpu.memory_space<vmem>>, vector<1x1x16x16xf32>
    %276 = vector.shape_cast %275 : vector<1x1x16x16xf32> to vector<16x16xf32>
    %277 = vector.shape_cast %274 : vector<16x16xf32> to vector<1x1x16x16xf32>
    tpu.vector_store %arg6[%c0_131, %c2_132, %c0_133, %c0_134], %277 {strides = array<i32>} : memref<1x8x16x16xf32, #tpu.memory_space<vmem>>, vector<1x1x16x16xf32>,
    %cst_135 = arith.constant 0.000000e+00 : f32
    %278 = vector.broadcast %cst_135 : f32 to vector<16x16xf32>
    %c3_136 = arith.constant 3 : index
    %279 = memref.load %arg5[%c3_136] : memref<8xf32, #tpu.memory_space<smem>>
    %280 = vector.broadcast %279 : f32 to vector<16x16xf32>
    %281 = arith.addf %278, %280 : vector<16x16xf32>
    %c3_137 = arith.constant 3 : index
    %c0_138 = arith.constant 0 : index
    %282 = memref.load %arg3[%c3_137, %c0_138] : memref<8x4xf32, #tpu.memory_space<smem>>
    %283 = vector.broadcast %282 : f32 to vector<16x16xf32>
    %284 = arith.mulf %55, %283 : vector<16x16xf32>
    %285 = arith.addf %281, %284 : vector<16x16xf32>
    %c3_139 = arith.constant 3 : index
    %c1_140 = arith.constant 1 : index
    %286 = memref.load %arg3[%c3_139, %c1_140] : memref<8x4xf32, #tpu.memory_space<smem>>
    %287 = vector.broadcast %286 : f32 to vector<16x16xf32>
    %288 = arith.mulf %106, %287 : vector<16x16xf32>
    %289 = arith.addf %285, %288 : vector<16x16xf32>
    %c3_141 = arith.constant 3 : index
    %c2_142 = arith.constant 2 : index
    %290 = memref.load %arg3[%c3_141, %c2_142] : memref<8x4xf32, #tpu.memory_space<smem>>
    %291 = vector.broadcast %290 : f32 to vector<16x16xf32>
    %292 = arith.mulf %157, %291 : vector<16x16xf32>
    %293 = arith.addf %289, %292 : vector<16x16xf32>
    %c3_143 = arith.constant 3 : index
    %c3_144 = arith.constant 3 : index
    %294 = memref.load %arg3[%c3_143, %c3_144] : memref<8x4xf32, #tpu.memory_space<smem>>
    %295 = vector.broadcast %294 : f32 to vector<16x16xf32>
    %296 = arith.mulf %208, %295 : vector<16x16xf32>
    %297 = arith.addf %293, %296 : vector<16x16xf32>
    %c0_145 = arith.constant 0 : index
    %c3_146 = arith.constant 3 : index
    %c0_147 = arith.constant 0 : index
    %c0_148 = arith.constant 0 : index
    %298 = vector.load %arg6[%c0_145, %c3_146, %c0_147, %c0_148] : memref<1x8x16x16xf32, #tpu.memory_space<vmem>>, vector<1x1x16x16xf32>
    %299 = vector.shape_cast %298 : vector<1x1x16x16xf32> to vector<16x16xf32>
    %300 = vector.shape_cast %297 : vector<16x16xf32> to vector<1x1x16x16xf32>
    tpu.vector_store %arg6[%c0_145, %c3_146, %c0_147, %c0_148], %300 {strides = array<i32>} : memref<1x8x16x16xf32, #tpu.memory_space<vmem>>, vector<1x1x16x16xf32>,
    %cst_149 = arith.constant 0.000000e+00 : f32
    %301 = vector.broadcast %cst_149 : f32 to vector<16x16xf32>
    %c4_150 = arith.constant 4 : index
    %302 = memref.load %arg5[%c4_150] : memref<8xf32, #tpu.memory_space<smem>>
    %303 = vector.broadcast %302 : f32 to vector<16x16xf32>
    %304 = arith.addf %301, %303 : vector<16x16xf32>
    %c4_151 = arith.constant 4 : index
    %c0_152 = arith.constant 0 : index
    %305 = memref.load %arg3[%c4_151, %c0_152] : memref<8x4xf32, #tpu.memory_space<smem>>
    %306 = vector.broadcast %305 : f32 to vector<16x16xf32>
    %307 = arith.mulf %55, %306 : vector<16x16xf32>
    %308 = arith.addf %304, %307 : vector<16x16xf32>
    %c4_153 = arith.constant 4 : index
    %c1_154 = arith.constant 1 : index
    %309 = memref.load %arg3[%c4_153, %c1_154] : memref<8x4xf32, #tpu.memory_space<smem>>
    %310 = vector.broadcast %309 : f32 to vector<16x16xf32>
    %311 = arith.mulf %106, %310 : vector<16x16xf32>
    %312 = arith.addf %308, %311 : vector<16x16xf32>
    %c4_155 = arith.constant 4 : index
    %c2_156 = arith.constant 2 : index
    %313 = memref.load %arg3[%c4_155, %c2_156] : memref<8x4xf32, #tpu.memory_space<smem>>
    %314 = vector.broadcast %313 : f32 to vector<16x16xf32>
    %315 = arith.mulf %157, %314 : vector<16x16xf32>
    %316 = arith.addf %312, %315 : vector<16x16xf32>
    %c4_157 = arith.constant 4 : index
    %c3_158 = arith.constant 3 : index
    %317 = memref.load %arg3[%c4_157, %c3_158] : memref<8x4xf32, #tpu.memory_space<smem>>
    %318 = vector.broadcast %317 : f32 to vector<16x16xf32>
    %319 = arith.mulf %208, %318 : vector<16x16xf32>
    %320 = arith.addf %316, %319 : vector<16x16xf32>
    %c0_159 = arith.constant 0 : index
    %c4_160 = arith.constant 4 : index
    %c0_161 = arith.constant 0 : index
    %c0_162 = arith.constant 0 : index
    %321 = vector.load %arg6[%c0_159, %c4_160, %c0_161, %c0_162] : memref<1x8x16x16xf32, #tpu.memory_space<vmem>>, vector<1x1x16x16xf32>
    %322 = vector.shape_cast %321 : vector<1x1x16x16xf32> to vector<16x16xf32>
    %323 = vector.shape_cast %320 : vector<16x16xf32> to vector<1x1x16x16xf32>
    tpu.vector_store %arg6[%c0_159, %c4_160, %c0_161, %c0_162], %323 {strides = array<i32>} : memref<1x8x16x16xf32, #tpu.memory_space<vmem>>, vector<1x1x16x16xf32>,
    %cst_163 = arith.constant 0.000000e+00 : f32
    %324 = vector.broadcast %cst_163 : f32 to vector<16x16xf32>
    %c5_164 = arith.constant 5 : index
    %325 = memref.load %arg5[%c5_164] : memref<8xf32, #tpu.memory_space<smem>>
    %326 = vector.broadcast %325 : f32 to vector<16x16xf32>
    %327 = arith.addf %324, %326 : vector<16x16xf32>
    %c5_165 = arith.constant 5 : index
    %c0_166 = arith.constant 0 : index
    %328 = memref.load %arg3[%c5_165, %c0_166] : memref<8x4xf32, #tpu.memory_space<smem>>
    %329 = vector.broadcast %328 : f32 to vector<16x16xf32>
    %330 = arith.mulf %55, %329 : vector<16x16xf32>
    %331 = arith.addf %327, %330 : vector<16x16xf32>
    %c5_167 = arith.constant 5 : index
    %c1_168 = arith.constant 1 : index
    %332 = memref.load %arg3[%c5_167, %c1_168] : memref<8x4xf32, #tpu.memory_space<smem>>
    %333 = vector.broadcast %332 : f32 to vector<16x16xf32>
    %334 = arith.mulf %106, %333 : vector<16x16xf32>
    %335 = arith.addf %331, %334 : vector<16x16xf32>
    %c5_169 = arith.constant 5 : index
    %c2_170 = arith.constant 2 : index
    %336 = memref.load %arg3[%c5_169, %c2_170] : memref<8x4xf32, #tpu.memory_space<smem>>
    %337 = vector.broadcast %336 : f32 to vector<16x16xf32>
    %338 = arith.mulf %157, %337 : vector<16x16xf32>
    %339 = arith.addf %335, %338 : vector<16x16xf32>
    %c5_171 = arith.constant 5 : index
    %c3_172 = arith.constant 3 : index
    %340 = memref.load %arg3[%c5_171, %c3_172] : memref<8x4xf32, #tpu.memory_space<smem>>
    %341 = vector.broadcast %340 : f32 to vector<16x16xf32>
    %342 = arith.mulf %208, %341 : vector<16x16xf32>
    %343 = arith.addf %339, %342 : vector<16x16xf32>
    %c0_173 = arith.constant 0 : index
    %c5_174 = arith.constant 5 : index
    %c0_175 = arith.constant 0 : index
    %c0_176 = arith.constant 0 : index
    %344 = vector.load %arg6[%c0_173, %c5_174, %c0_175, %c0_176] : memref<1x8x16x16xf32, #tpu.memory_space<vmem>>, vector<1x1x16x16xf32>
    %345 = vector.shape_cast %344 : vector<1x1x16x16xf32> to vector<16x16xf32>
    %346 = vector.shape_cast %343 : vector<16x16xf32> to vector<1x1x16x16xf32>
    tpu.vector_store %arg6[%c0_173, %c5_174, %c0_175, %c0_176], %346 {strides = array<i32>} : memref<1x8x16x16xf32, #tpu.memory_space<vmem>>, vector<1x1x16x16xf32>,
    %cst_177 = arith.constant 0.000000e+00 : f32
    %347 = vector.broadcast %cst_177 : f32 to vector<16x16xf32>
    %c6_178 = arith.constant 6 : index
    %348 = memref.load %arg5[%c6_178] : memref<8xf32, #tpu.memory_space<smem>>
    %349 = vector.broadcast %348 : f32 to vector<16x16xf32>
    %350 = arith.addf %347, %349 : vector<16x16xf32>
    %c6_179 = arith.constant 6 : index
    %c0_180 = arith.constant 0 : index
    %351 = memref.load %arg3[%c6_179, %c0_180] : memref<8x4xf32, #tpu.memory_space<smem>>
    %352 = vector.broadcast %351 : f32 to vector<16x16xf32>
    %353 = arith.mulf %55, %352 : vector<16x16xf32>
    %354 = arith.addf %350, %353 : vector<16x16xf32>
    %c6_181 = arith.constant 6 : index
    %c1_182 = arith.constant 1 : index
    %355 = memref.load %arg3[%c6_181, %c1_182] : memref<8x4xf32, #tpu.memory_space<smem>>
    %356 = vector.broadcast %355 : f32 to vector<16x16xf32>
    %357 = arith.mulf %106, %356 : vector<16x16xf32>
    %358 = arith.addf %354, %357 : vector<16x16xf32>
    %c6_183 = arith.constant 6 : index
    %c2_184 = arith.constant 2 : index
    %359 = memref.load %arg3[%c6_183, %c2_184] : memref<8x4xf32, #tpu.memory_space<smem>>
    %360 = vector.broadcast %359 : f32 to vector<16x16xf32>
    %361 = arith.mulf %157, %360 : vector<16x16xf32>
    %362 = arith.addf %358, %361 : vector<16x16xf32>
    %c6_185 = arith.constant 6 : index
    %c3_186 = arith.constant 3 : index
    %363 = memref.load %arg3[%c6_185, %c3_186] : memref<8x4xf32, #tpu.memory_space<smem>>
    %364 = vector.broadcast %363 : f32 to vector<16x16xf32>
    %365 = arith.mulf %208, %364 : vector<16x16xf32>
    %366 = arith.addf %362, %365 : vector<16x16xf32>
    %c0_187 = arith.constant 0 : index
    %c6_188 = arith.constant 6 : index
    %c0_189 = arith.constant 0 : index
    %c0_190 = arith.constant 0 : index
    %367 = vector.load %arg6[%c0_187, %c6_188, %c0_189, %c0_190] : memref<1x8x16x16xf32, #tpu.memory_space<vmem>>, vector<1x1x16x16xf32>
    %368 = vector.shape_cast %367 : vector<1x1x16x16xf32> to vector<16x16xf32>
    %369 = vector.shape_cast %366 : vector<16x16xf32> to vector<1x1x16x16xf32>
    tpu.vector_store %arg6[%c0_187, %c6_188, %c0_189, %c0_190], %369 {strides = array<i32>} : memref<1x8x16x16xf32, #tpu.memory_space<vmem>>, vector<1x1x16x16xf32>,
    %cst_191 = arith.constant 0.000000e+00 : f32
    %370 = vector.broadcast %cst_191 : f32 to vector<16x16xf32>
    %c7_192 = arith.constant 7 : index
    %371 = memref.load %arg5[%c7_192] : memref<8xf32, #tpu.memory_space<smem>>
    %372 = vector.broadcast %371 : f32 to vector<16x16xf32>
    %373 = arith.addf %370, %372 : vector<16x16xf32>
    %c7_193 = arith.constant 7 : index
    %c0_194 = arith.constant 0 : index
    %374 = memref.load %arg3[%c7_193, %c0_194] : memref<8x4xf32, #tpu.memory_space<smem>>
    %375 = vector.broadcast %374 : f32 to vector<16x16xf32>
    %376 = arith.mulf %55, %375 : vector<16x16xf32>
    %377 = arith.addf %373, %376 : vector<16x16xf32>
    %c7_195 = arith.constant 7 : index
    %c1_196 = arith.constant 1 : index
    %378 = memref.load %arg3[%c7_195, %c1_196] : memref<8x4xf32, #tpu.memory_space<smem>>
    %379 = vector.broadcast %378 : f32 to vector<16x16xf32>
    %380 = arith.mulf %106, %379 : vector<16x16xf32>
    %381 = arith.addf %377, %380 : vector<16x16xf32>
    %c7_197 = arith.constant 7 : index
    %c2_198 = arith.constant 2 : index
    %382 = memref.load %arg3[%c7_197, %c2_198] : memref<8x4xf32, #tpu.memory_space<smem>>
    %383 = vector.broadcast %382 : f32 to vector<16x16xf32>
    %384 = arith.mulf %157, %383 : vector<16x16xf32>
    %385 = arith.addf %381, %384 : vector<16x16xf32>
    %c7_199 = arith.constant 7 : index
    %c3_200 = arith.constant 3 : index
    %386 = memref.load %arg3[%c7_199, %c3_200] : memref<8x4xf32, #tpu.memory_space<smem>>
    %387 = vector.broadcast %386 : f32 to vector<16x16xf32>
    %388 = arith.mulf %208, %387 : vector<16x16xf32>
    %389 = arith.addf %385, %388 : vector<16x16xf32>
    %c0_201 = arith.constant 0 : index
    %c7_202 = arith.constant 7 : index
    %c0_203 = arith.constant 0 : index
    %c0_204 = arith.constant 0 : index
    %390 = vector.load %arg6[%c0_201, %c7_202, %c0_203, %c0_204] : memref<1x8x16x16xf32, #tpu.memory_space<vmem>>, vector<1x1x16x16xf32>
    %391 = vector.shape_cast %390 : vector<1x1x16x16xf32> to vector<16x16xf32>
    %392 = vector.shape_cast %389 : vector<16x16xf32> to vector<1x1x16x16xf32>
    tpu.vector_store %arg6[%c0_201, %c7_202, %c0_203, %c0_204], %392 {strides = array<i32>} : memref<1x8x16x16xf32, #tpu.memory_space<vmem>>, vector<1x1x16x16xf32>,
    return
  }
  func.func @transform_0(%arg0: i32) -> (i32, i32, i32, i32) {
    %c0_i32 = arith.constant 0 : i32
    %c0_i32_0 = arith.constant 0 : i32
    %c0_i32_1 = arith.constant 0 : i32
    %c0_i32_2 = arith.constant 0 : i32
    return %arg0, %c0_i32, %c0_i32_0, %c0_i32_1 : i32, i32, i32, i32
  }
  func.func @transform_1(%arg0: i32) -> (i32, i32) {
    %c0_i32 = arith.constant 0 : i32
    %c0_i32_0 = arith.constant 0 : i32
    %c0_i32_1 = arith.constant 0 : i32
    return %c0_i32, %c0_i32_0 : i32, i32
  }
  func.func @transform_2(%arg0: i32) -> (i32, i32) {
    %c0_i32 = arith.constant 0 : i32
    %c0_i32_0 = arith.constant 0 : i32
    %c0_i32_1 = arith.constant 0 : i32
    return %c0_i32, %c0_i32_0 : i32, i32
  }
  func.func @transform_3(%arg0: i32) -> i32 {
    %c0_i32 = arith.constant 0 : i32
    %c0_i32_0 = arith.constant 0 : i32
    return %c0_i32 : i32
  }
  func.func @transform_4(%arg0: i32) -> i32 {
    %c0_i32 = arith.constant 0 : i32
    %c0_i32_0 = arith.constant 0 : i32
    return %c0_i32 : i32
  }
  func.func @transform_5(%arg0: i32) -> (i32, i32, i32, i32) {
    %c0_i32 = arith.constant 0 : i32
    %c0_i32_0 = arith.constant 0 : i32
    %c0_i32_1 = arith.constant 0 : i32
    %c0_i32_2 = arith.constant 0 : i32
    return %arg0, %c0_i32, %c0_i32_0, %c0_i32_1 : i32, i32, i32, i32
  }
}

</mosaic_0001>

<bundles_post_ra>
// kernel: tpu_custom_call.1
= control target key start
LH: loop header
LB: loop body
LE: loop exit
PB: predicated region body
PF: predicated region fallthrough
CT: control target
= control target key end

     0   :  { %s2800_s0 = inlined_call_operand.hbm [shape: f32[2,4,16,16], index: 0, kind: input, shape index: {}]   ;;  %s2801_s1 = inlined_call_operand.vmem [shape: f32[4,9], index: 1, kind: input, shape index: {}]   ;;  %s2802_s2 = inlined_call_operand.vmem [shape: f32[8,4], index: 2, kind: input, shape index: {}]   ;;  %s2803_s3 = inlined_call_operand.vmem [shape: f32[4], index: 3, kind: input, shape index: {}]   ;;  %s2804_s4 = inlined_call_operand.vmem [shape: f32[8], index: 4, kind: input, shape index: {}]   ;;  %s2805_s5 = inlined_call_operand.hbm [shape: f32[2,8,16,16], index: 5, kind: output, shape index: {}]  }
   0x1   :  { %2816 = sst [smem:[#allocation29_spill]] %s2800_s0 }
   0x2   :  { %2817 = sst [smem:[#allocation30_spill]] %s2801_s1 }
   0x3   :  { %2818 = sst [smem:[#allocation31_spill]] %s2802_s2 }
   0x4   :  { %2819 = sst [smem:[#allocation32_spill]] %s2803_s3 }
   0x5   :  { %2820 = sst [smem:[#allocation33_spill]] %s2804_s4 }
   0x6   :  { %10 = vsyncpa [#allocation4], 0 }
   0x7   :  { %12 = vsyncpa [#allocation4 + $0x1], 0 }
   0x8   :  { %13 = vsyncpa [#allocation6], 0 }
   0x9   :  { %14 = vsyncpa [#allocation9], 0 }
   0xa   :  { %15 = vsyncpa [#allocation12], 0 }
   0xb   :  { %16 = vsyncpa [#allocation5], 0 }
   0xc   :  { %18 = vsyncpa [#allocation5 + $0x1], 0  ;;  %s1792_s18 = smov 0   ;;  %s1794_s19 = smov 0  }
   0xd   :  { %s1796_s20 = smov 0   ;;  %s1798_s21 = smov 0  }
   0xe LB: > { %2821 = sst [smem:[#allocation19_spill]] %s1740_s19  ;;  %s1813_s22 = sadd.s32 4294967295, %s1748_s21   ;;  %s1748_s21 = sphi %s1798_s21, %s2856_s21   ;;  %s1744_s20 = sphi %s1796_s20, %s2859_s20   ;;  %s1740_s19 = sphi %s1794_s19, %s2858_s19   ;;  %s1736_s18 = sphi %s1792_s18, %s2857_s18  }
   0xf   : > { %2822 = sst [smem:[#allocation20_spill]] %s1744_s20  ;;  %s1371_s23 = sadd.s32 4294967294, %s1748_s21  }
  0x10   : > { %2823 = sst [smem:[#allocation21_spill]] %s1748_s21  ;;  %p44_p0 = scmp.ne.s32.totalorder %s1740_s19, %s1736_s18 }
  0x11   : > { %p45_p1 = scmp.eq.s32.totalorder %s1813_s22, 0  ;;  %p152_p2 = scmp.eq.s32.totalorder %s1813_s22, 1 }
  0x12   : > { %p158_p3 = scmp.eq.s32.totalorder %s1371_s23, 1  ;;  %p1372_p5 = scmp.ge.s32.totalorder %s1748_s21, 1 }
  0x13   : > { %p1822_p4 = por %p45_p1, %p44_p0  ;;  %p165_p7 = scmp.lt.s32.totalorder %s1748_s21, 3 }
  0x14   : > { %p1827_p6 = por %p158_p3, %p44_p0  ;;  %s2827_s2 = sld [smem:[#allocation31_spill]] }
  0x15   : > { %p1835_p8 = pnand %p1372_p5, %p165_p7  ;;  %s2829_s1 = sld [smem:[#allocation30_spill]] }
  0x16   : > { %s2825_s25 = scalar_select %p1827_p6, 1, 0 }
  0x17   : > { %p1505_p10 = pneg %p1835_p8  ;;  %s2830_s3 = sld [smem:[#allocation32_spill]] }
  0x18   : > { %2826 = sst [smem:[#allocation22_spill]] %s2825_s25  ;;  %s1750_s14 = smov [#allocation8]  }
  0x19   : > { %p1506_p11 = pnand %p1505_p10, %p45_p1  ;;  %s2831_s4 = sld [smem:[#allocation33_spill]] }
  0x1a   : > { %s187_s28 = sshll.u32 %s2827_s2, 4  ;;  %s1751_s15 = smov [#allocation7]   ;;  %s188_s28 = int_to_ptr.vmem [resolvable:$true] %s187_s28 }
  0x1b   : > { %s177_s7 = sshll.u32 %s2829_s1, 4  ;;  %s1752_s16 = smov [#allocation10]   ;;  %s178_s7 = int_to_ptr.vmem [resolvable:$true] %s177_s7 }
  0x1c   : > { %1511 = dma.vmem_to_smem (!%p1506_p11), %s188_s28, 128, %s1750_s14, [#allocation9]  }
  0x1d   : > { %s197_s10 = sshll.u32 %s2830_s3, 4  ;;  %s1753_s17 = smov [#allocation11]   ;;  %s198_s10 = int_to_ptr.vmem [resolvable:$true] %s197_s10 }
  0x1e   : > { %1508 = dma.vmem_to_smem (!%p1506_p11), %s178_s7, 64, %s1751_s15, [#allocation6]  }
  0x1f   : > { %s207_s13 = sshll.u32 %s2831_s4, 4  ;;  %s1854_s23 = sadd.s32 1, %s1748_s21   ;;  %s208_s13 = int_to_ptr.vmem [resolvable:$true] %s207_s13 }
  0x20   : > { %1514 = dma.vmem_to_smem (!%p1506_p11), %s198_s10, 16, %s1752_s16, [#allocation9]  }
  0x21   : > { %1517 = dma.vmem_to_smem (!%p1506_p11), %s208_s13, 16, %s1753_s17, [#allocation12]  }
  0x22   : > { %2832 = sst [smem:[#allocation23_spill]] %s1854_s23  ;;  %s28_s26 = ssub.s32 %s1748_s21, %s1854_s23 }
  0x23   : > { %p29_p12 = scmp.eq.s32.totalorder %s28_s26, 0  ;;  %s31_s27 = sadd.s32 1, %s1744_s20 }
  0x24   : > { %p38_p13 = scmp.ne.s32.totalorder %s1744_s20, %s1740_s19  ;;  %p39_p0 = scmp.eq.s32.totalorder %s1748_s21, 0 }
  0x25   : > { %s1863_s28 = scalar_select %p29_p12, %s1744_s20, %s31_s27  }
  0x26   : > { %p40_p3 = por %p39_p0, %p38_p13  ;;  %p1867_p5 = por %p152_p2, %p38_p13 }
  0x27   : > { %2833 = sst [smem:[#allocation24_spill]] %s1863_s28  ;;  %p1530_p7 = scmp.lt.s32.totalorder %s1748_s21, 2 }
  0x28   : > { %s218_s6 = sand.u32 1, %s1744_s20   ;;  %s1483_s8 = sshll.u32 %s1748_s21, 6 }
  0x29   : > { %s1378_s7 = sshll.u32 %s218_s6, 6  ;;  %s2835_s0 = sld [smem:[#allocation29_spill]] }
  0x2a   : > { %s222_s12 = scalar_lea.vmem [#allocation3], %s1378_s7  ;;  %p1877_p10 = pnand %p1530_p7, %p40_p3 }
  0x2b   : > { %s230_s13 = sshll.u32 %s222_s12, 4  ;;  %s219_s16 = scalar_lea.sflag [#allocation4], %s218_s6  ;;  %s231_s13 = int_to_ptr.vmem [resolvable:$true] %s230_s13 }
  0x2c   : > { %p1644_p11 = pneg %p1877_p10 }
  0x2f   : > { %s227_s11 = scalar_lea.hbm %s2835_s0, %s1483_s8  ;;  %s1647_s8 = scalar_lea.hbm %s2835_s0, 128 }
  0x30   : > { %s228_s14 = sshll.u32 %s227_s11, 4  ;;  %s229_s14 = int_to_ptr.hbm [resolvable:$true] %s228_s14 }
  0x31   : > { %s1640_s17 = sshra.s32 %s229_s14, 4  ;;  %s1641_s17 = int_to_ptr.hbm [resolvable:$true] %s1640_s17 }
  0x32   : > { %s1642_s26 = scalar_lea.hbm %s1641_s17, 64  ;;  %p1648_p0 = scmp.lt.s32.totalorder %s1641_s17, %s2835_s0 }
  0x33   : > { %p1643_p2 = scmp.ne.s32.totalorder %s1641_s17, %s1642_s26  ;;  %p1649_p3 = scmp.lt.s32.totalorder %s1647_s8, %s1642_s26 }
  0x35   : > { %p1645_p12 = pnand %p1644_p11, %p1643_p2  ;;  %p1650_p7 = por %p1649_p3, %p1648_p0 }
  0x37   : > { %p1646_p13 = pneg %p1645_p12 }
  0x39   : > { %p1651_p9 = pnand %p1650_p7, %p1646_p13 }
  0x3b   : > { %1654 = shalt.err (!%p1651_p9)
}
  0x3c   : > { %s1754_s6 = smov 128   ;;  %s1755_s11 = smov 8  }
  0x3d   : > { %1521 = dma.hbm_to_vmem [thread:$0]  (!%p1877_p10), %s229_s14, 1024, %s231_s13, %s219_s16, %s1754_s6, %s1754_s6, %s1755_s11  }
  0x3e   : > { %242 = sbr.rel (%p1835_p8) target bundleno = 472 (0x1d8), region = 40 }
  0x43   : > { %s1894_s12 = sand.u32 1, %s1740_s19  }
  0x44   : > { %s1382_s27 = sshll.u32 %s1894_s12, 6  ;;  %s245_s17 = scalar_lea.sflag [#allocation4], %s1894_s12 }
  0x45   : > { %s248_s26 = scalar_lea.vmem [#allocation3], %s1382_s27 }
  0x46   : > { %1715 = dma.done.wait (%p1822_p4), %s245_s17, 1024  }
  0x47   : > { %1717 = vsyncadd (%p1822_p4), %s245_s17, 4294966272 }
  0x48   : > { %1719 = dma.done.wait (%p45_p1), [#allocation6], 64  }
  0x49   : > { %1721 = vsyncadd (%p45_p1), [#allocation6], 4294967232 }
  0x4a   : > { %1723 = dma.done.wait (%p45_p1), [#allocation9], 144  }
  0x4b   : > { %1725 = vsyncadd (%p45_p1), [#allocation9], 4294967152 }
  0x4c   : > { %1727 = dma.done.wait (%p45_p1), [#allocation12], 16  }
  0x4d   : > { %1729 = vsyncadd (%p45_p1), [#allocation12], 4294967280 }
  0x4e   : > { %274 = sfence }
  0x4f   : > { %v313_v0 = vld [vmem:[%s248_s26 + $0x10] sm:$0xff]  ;;  %v311_v1 = vld [vmem:[%s248_s26] sm:$0xff]  ;;  %s1756_s24 = smov 1   ;;  %v314_v3 = vld [vmem:[%s248_s26 + $0x18] sm:$0xff]  ;;  %vm297_vm0 = vcmask 146432   ;;  %v1757_v8 = vmov 0.0  }
  0x50   : > { %331 = vrot.lane.b32.xlu1 %v313_v0, %s1756_s24  ;;  %327 = vrot.lane.b32.xlu0 %v311_v1, %s1756_s24  ;;  %v315_v2 = vld [vmem:[%s248_s26 + $0x20] sm:$0xff]  ;;  %v312_v4 = vld [vmem:[%s248_s26 + $0x8] sm:$0xff]  ;;  %302 = vst.msk [vmem:[#allocation2 + $0x18] sm:$0xff] %vm297_vm0, %v1757_v8  ;;  %vm300_vm1 = vcmask 140288   ;;  %vm351_vm2 = vcmask 138248   ;;  %s1411_s29 = sld [smem:[#allocation7 + $0x105]] }
  0x51   : > { %335 = vrot.lane.b32.xlu2 %v315_v2, %s1756_s24  ;;  %v316_v5 = vld [vmem:[%s248_s26 + $0x28] sm:$0xff]  ;;  %v318_v6 = vld [vmem:[%s248_s26 + $0x38] sm:$0xff]  ;;  %v317_v7 = vld [vmem:[%s248_s26 + $0x30] sm:$0xff]  ;;  %303 = vst.msk [vmem:[#allocation2 + $0x20] sm:$0xff] %vm297_vm0, %v1757_v8  ;;  %s1413_s13 = sld [smem:[#allocation7 + $0x107]]  ;;  %s1758_s11 = smov 126  }
  0x52   : > { %298 = vst.msk [vmem:[#allocation2] sm:$0xff] %vm297_vm0, %v1757_v8  ;;  %s1916_s14 = sld [smem:[#allocation7 + $0x2]]  ;;  %s1759_s27 = smov 127   ;;  %vm405_vm3 = vcmask 1046528   ;;  %vm465_vm4 = vcmask 1045504   ;;  %vm1028_vm5 = vcmask 130048  }
  0x53   : > { %299 = vst.msk [vmem:[#allocation2 + $0x8] sm:$0xff] %vm297_vm0, %v1757_v8  ;;  %s1918_s15 = sld [smem:[#allocation7 + $0x1]] }
  0x54   : > { %305 = vst.msk [vmem:[#allocation2 + $0x30] sm:$0xff] %vm297_vm0, %v1757_v8  ;;  %s1932_s16 = sld [smem:[#allocation7 + $0x82]] }
  0x55   : > { %306 = vst.msk [vmem:[#allocation2 + $0x38] sm:$0xff] %vm297_vm0, %v1757_v8  ;;  %s1942_s7 = sld [smem:[#allocation7 + $0x81]] }
  0x56   : > { %308 = vst.msk [vmem:[#allocation2 + $0x48] sm:$0xff] %vm297_vm0, %v1757_v8  ;;  %v1926_v15 = vstv %s1411_s29  ;;  %s1950_s8 = sld [smem:[#allocation7 + $0x4]] }
  0x57   : > { %309 = vst.msk [vmem:[#allocation2 + $0x50] sm:$0xff] %vm297_vm0, %v1757_v8  ;;  %v1930_v17 = vstv %s1413_s13  ;;  %s1955_s9 = sld [smem:[#allocation7 + $0x7]] }
  0x58   : > { %333 = vrot.lane.b32.xlu1 %v314_v3, %s1756_s24  ;;  %329 = vrot.lane.b32.xlu0 %v312_v4, %s1756_s24  ;;  %304 = vst.msk [vmem:[#allocation2 + $0x28] sm:$0x3] %vm300_vm1, %v1757_v8  ;;  %v384_v20 = vstv %s1916_s14  ;;  %s1960_s10 = sld [smem:[#allocation7 + $0x102]] }
  0x59   : > { %337 = vrot.lane.b32.xlu2 %v316_v5, %s1756_s24  ;;  %301 = vst.msk [vmem:[#allocation2 + $0x10] sm:$0x3] %vm300_vm1, %v1757_v8  ;;  %v370_v21 = vstv %s1918_s15  ;;  %s1963_s6 = sld [smem:[#allocation7 + $0x101]] }
  0x5a   : > { %307 = vst.msk [vmem:[#allocation2 + $0x40] sm:$0x3] %vm300_vm1, %v1757_v8  ;;  %s1414_s17 = sld [smem:[#allocation7 + $0x108]]  ;;  %v546_v34 = vstv %s1932_s16 }
  0x5b   : > { %310 = vst.msk [vmem:[#allocation2 + $0x58] sm:$0x3] %vm300_vm1, %v1757_v8  ;;  %s1395_s26 = sld [smem:[#allocation7 + $0x8]]  ;;  %v532_v48 = vstv %s1942_s7 }
  0x5c   : > { %s1976_s29 = sld [smem:[#allocation7 + $0x84]]  ;;  %v416_v44 = vstv %s1950_s8 }
  0x5d   : > { %s1986_s13 = sld [smem:[#allocation7 + $0x181]]  ;;  %v1999_v43 = vstv %s1955_s9 }
  0x5e   : > { %s1991_s14 = sld [smem:[#allocation7 + $0x3]]  ;;  %v706_v46 = vstv %s1960_s10 }
  0x5f   : > { %s1996_s15 = sld [smem:[#allocation7 + $0x182]]  ;;  %v692_v47 = vstv %s1963_s6 }
  0x60   : > { %341 = vrot.lane.b32.xlu1 %v318_v6, %s1756_s24  ;;  %339 = vrot.lane.b32.xlu0 %v317_v7, %s1756_s24  ;;  %s1392_s24 = sld [smem:[#allocation7 + $0x5]]  ;;  %v817_v45 = vstv %s1414_s17 }
  0x61   : > { %s2004_s0 = sld [smem:[#allocation7 + $0x185]]  ;;  %v2014_v50 = vstv %s1395_s26 }
  0x62   : > { %s2023_s8 = sld [smem:[#allocation7 + $0x184]]  ;;  %v2036_v59 = vstv %s1976_s29 }
  0x63   : > { %v852_v61 = vstv %s1986_s13  ;;  %s2056_s7 = sld [smem:[#allocation7 + $0x187]] }
  0x64   : > { %v2046_v0 = vstv %s1991_s14  ;;  %s2072_s9 = sld [smem:[#allocation7 + $0x188]] }
  0x65   : > { %v2808_v3 = vstv %s1996_s15  ;;  %s2138_s16 = sld [smem:[#allocation7 + $0x83]] }
  0x66   : > { %v2021_v53 = vstv %s1392_s24  ;;  %s2153_s10 = sld [smem:[#allocation7 + $0x103]] }
  0x67   : > { %s2174_s6 = sld [smem:[#allocation7 + $0x183]] }
  0x68   : > { %s2192_s17 = sld [smem:[#allocation7 + $0x86]] }
  0x69   : > { %s2217_s26 = sld [smem:[#allocation7 + $0x106]] }
  0x6a   : > { %s2229_s24 = sld [smem:[#allocation7 + $0x186]] }
  0x6b   : > { %s2263_s29 = sld [smem:[#allocation7 + $0x87]] }
  0x6c   : > { %s1404_s13 = sld [smem:[#allocation7 + $0x88]] }
  0x6d   : > { %s1401_s14 = sld [smem:[#allocation7 + $0x85]] }
  0x6e   : > { %s2468_s1 = sld [smem:[#allocation8 + $0x380]] }
  0x6f   : > { %s2472_s2 = sld [smem:[#allocation10 + $0x1]] }
  0x70   : > { %s2474_s3 = sld [smem:[#allocation8 + $0x1]] }
  0x71   : > { %s2478_s4 = sld [smem:[#allocation8 + $0x81]] }
  0x72   : > { %s2480_s28 = sld [smem:[#allocation8 + $0x101]] }
  0x73   : > { %s2482_s20 = sld [smem:[#allocation8 + $0x181]] }
  0x74   : > { %s2484_s19 = sld [smem:[#allocation8 + $0x201]] }
  0x75   : > { %s2486_s23 = sld [smem:[#allocation8 + $0x281]] }
  0x76   : > { %s2488_s21 = sld [smem:[#allocation8 + $0x301]] }
  0x77   : > { %s2496_s25 = sld [smem:[#allocation8 + $0x381]] }
  0xab   : > { %v336_v9 = vpop.permute.xlu2 %335 }
  0xac   : > { %356 = vst.msk [vmem:[#allocation2 + $0x31] sm:$0xff] %vm351_vm2, %v336_v9 }
  0xb3   : > { %v338_v10 = vpop.permute.xlu2 %337  ;;  %v1922_v13 = vld [vmem:[#allocation2 + $0x30] sm:$0xff] }
  0xb4   : > { %357 = vst.msk [vmem:[#allocation2 + $0x39] sm:$0xff] %vm351_vm2, %v338_v10  ;;  %v759_v19 = vmul.f32 %v1926_v15, %v1922_v13  ;;  %v797_v54 = vmul.f32 %v1930_v17, %v1922_v13  ;;  %v2028_v55 = vmul.f32 %v817_v45, %v1922_v13  ;;  %v707_v56 = vmul.f32 %v706_v46, %v1922_v13 }
  0xb5   : > { %v2033_v58 = vmul.f32 %v692_v47, %v1922_v13 }
  0xb6   : > { %v765_v30 = vrot.slane %v759_v19, 1  ;;  %v803_v8 = vrot.slane %v797_v54, 2  ;;  %v824_v10 = vrot.slane %v2028_v55, 2 }
  0xbb   : > { %v1924_v14 = vld [vmem:[#allocation2 + $0x38] sm:$0xff]  ;;  %v1928_v16 = vld [vmem:[#allocation2 + $0x40] sm:$0x3] }
  0xbc   : > { %v1936_v18 = vmul.f32 %v1926_v15, %v1924_v14  ;;  %v1946_v22 = vmul.f32 %v1930_v17, %v1924_v14  ;;  %v799_v23 = vmul.f32 %v1930_v17, %v1928_v16  ;;  %v694_v57 = vmul.f32 %v692_v47, %v1924_v14 }
  0xbd   : > { %v2043_v63 = vmul.f32 %v706_v46, %v1924_v14  ;;  %v819_v9 = vmul.f32 %v817_v45, %v1924_v14  ;;  %v820_v19 = vmul.f32 %v817_v45, %v1928_v16 }
  0xbe   : > { %v2806_v29 = vrot.slane %v1936_v18, 1  ;;  %v804_v31 = vrot.slane %v1946_v22, 2  ;;  %v806_v32 = vrot.slane %v799_v23, 2  ;;  %v956_v22 = vstv %s2056_s7  ;;  %s2375_s7 = sld [smem:[#allocation7 + $0x80]] }
  0xc0   : > { %v1974_v35 = vsel %vm405_vm3, %v765_v30, %v2806_v29  ;;  %v1981_v36 = vsel %vm465_vm4, %v804_v31, %v806_v32 }
  0xc2   : > { %v332_v11 = vpop.permute.xlu1 %331  ;;  %v328_v12 = vpop.permute.xlu0 %327 }
  0xc3   : > { %354 = vst.msk [vmem:[#allocation2 + $0x19] sm:$0xff] %vm351_vm2, %v332_v11 }
  0xc4   : > { %352 = vst.msk [vmem:[#allocation2 + $0x1] sm:$0xff] %vm351_vm2, %v328_v12  ;;  %v918_v12 = vstv %s2004_s0  ;;  %s2128_s0 = sld [smem:[#allocation7 + $0x6]] }
  0xca   : > { %v334_v24 = vpop.permute.xlu1 %333  ;;  %v330_v25 = vpop.permute.xlu0 %329  ;;  %v1968_v33 = vld [vmem:[#allocation2 + $0x18] sm:$0xff] }
  0xcb   : > { %355 = vst.msk [vmem:[#allocation2 + $0x21] sm:$0xff] %vm351_vm2, %v334_v24  ;;  %v1953_v26 = vld [vmem:[#allocation2] sm:$0xff]  ;;  %v547_v37 = vmul.f32 %v546_v34, %v1968_v33  ;;  %v533_v60 = vmul.f32 %v532_v48, %v1968_v33 }
  0xcc   : > { %353 = vst.msk [vmem:[#allocation2 + $0x9] sm:$0xff] %vm351_vm2, %v330_v25  ;;  %v385_v27 = vmul.f32 %v384_v20, %v1953_v26  ;;  %v371_v28 = vmul.f32 %v370_v21, %v1953_v26  ;;  %v2012_v49 = vmul.f32 %v1999_v43, %v1953_v26  ;;  %v2019_v52 = vmul.f32 %v416_v44, %v1953_v26 }
  0xce   : > { %389 = vrot.lane.b32.xlu1 %v385_v27, %s1758_s11  ;;  %375 = vrot.lane.b32.xlu2 %v371_v28, %s1759_s27  ;;  %v483_v4 = vrot.slane %v2012_v49, 2 }
  0xd2   : > { %v342_v38 = vpop.permute.xlu1 %341  ;;  %v340_v39 = vpop.permute.xlu0 %339  ;;  %v2016_v51 = vld [vmem:[#allocation2 + $0x20] sm:$0xff]  ;;  %v2054_v5 = vld [vmem:[#allocation2 + $0x28] sm:$0x3] }
  0xd3   : > { %v1988_v40 = vld [vmem:[#allocation2 + $0x8] sm:$0xff]  ;;  %359 = vst.msk [vmem:[#allocation2 + $0x51] sm:$0xff] %vm351_vm2, %v342_v38  ;;  %v2040_v62 = vld [vmem:[#allocation2 + $0x10] sm:$0x3]  ;;  %v534_v1 = vmul.f32 %v532_v48, %v2016_v51  ;;  %v548_v23 = vmul.f32 %v546_v34, %v2016_v51  ;;  %v2090_v25 = vmul.f32 %v2036_v59, %v2016_v51  ;;  %v2094_v27 = vmul.f32 %v2036_v59, %v2054_v5 }
  0xd4   : > { %v372_v41 = vmul.f32 %v370_v21, %v1988_v40  ;;  %v386_v42 = vmul.f32 %v384_v20, %v1988_v40  ;;  %358 = vst.msk [vmem:[#allocation2 + $0x49] sm:$0xff] %vm351_vm2, %v340_v39  ;;  %v2050_v2 = vmul.f32 %v416_v44, %v1988_v40  ;;  %v2066_v11 = vmul.f32 %v416_v44, %v2040_v62 }
  0xd5   : > { %v2076_v20 = vmul.f32 %v2046_v0, %v1953_v26  ;;  %v2086_v24 = vmul.f32 %v1999_v43, %v1988_v40  ;;  %v2099_v30 = vmul.f32 %v2014_v50, %v1988_v40  ;;  %v2103_v32 = vmul.f32 %v2014_v50, %v2040_v62 }
  0xd6   : > { %377 = vrot.lane.b32.xlu0 %v372_v41, %s1759_s27  ;;  %551 = vrot.lane.b32.xlu1 %v547_v37, %s1758_s11  ;;  %v2809_v28 = vrot.slane %v2050_v2, 1  ;;  %v897_v38 = vstv %s2023_s8  ;;  %v2112_v41 = vsel %vm465_vm4, %v803_v8, %v804_v31  ;;  %v426_v44 = vrot.slane %v2066_v11, 1  ;;  %s2353_s8 = sld [smem:[#allocation7]] }
  0xd7   : > { %391 = vrot.lane.b32.xlu2 %v386_v42, %s1758_s11  ;;  %v827_v31 = vrot.slane %v820_v19, 2  ;;  %v977_v19 = vstv %s2072_s9  ;;  %v406_v29 = vrot.slane %v2076_v20, 1  ;;  %s2391_s9 = sld [smem:[#allocation7 + $0x100]] }
  0xda   : > { %v2069_v17 = vld [vmem:[#allocation2 + $0x58] sm:$0x3] }
  0xdb   : > { %v2058_v6 = vld [vmem:[#allocation2 + $0x48] sm:$0xff]  ;;  %v2079_v21 = vld [vmem:[#allocation2 + $0x50] sm:$0xff]  ;;  %v921_v39 = vmul.f32 %v918_v12, %v2069_v17  ;;  %v900_v54 = vmul.f32 %v897_v38, %v2069_v17 }
  0xdc   : > { %v919_v34 = vmul.f32 %v918_v12, %v2058_v6  ;;  %v920_v37 = vmul.f32 %v918_v12, %v2079_v21  ;;  %v854_v42 = vmul.f32 %v852_v61, %v2079_v21  ;;  %v898_v46 = vmul.f32 %v897_v38, %v2058_v6 }
  0xdd   : > { %v899_v48 = vmul.f32 %v897_v38, %v2079_v21  ;;  %v928_v55 = vrot.slane %v921_v39, 1  ;;  %v907_v12 = vrot.slane %v900_v54, 1 }
  0xde   : > { %539 = vrot.lane.b32.xlu0 %v534_v1, %s1759_s27  ;;  %711 = vrot.lane.b32.xlu1 %v707_v56, %s1758_s11  ;;  %v925_v45 = vrot.slane %v919_v34, 1  ;;  %v926_v47 = vrot.slane %v920_v37, 1  ;;  %v904_v56 = vrot.slane %v898_v46, 1  ;;  %v957_v34 = vmul.f32 %v956_v22, %v2058_v6 }
  0xdf   : > { %537 = vrot.lane.b32.xlu2 %v533_v60, %s1759_s27  ;;  %v825_v60 = vrot.slane %v819_v9, 2  ;;  %v905_v8 = vrot.slane %v899_v48, 1  ;;  %v958_v37 = vmul.f32 %v956_v22, %v2079_v21  ;;  %v980_v46 = vmul.f32 %v977_v19, %v2069_v17 }
  0xe0   : > { %v2123_v1 = vsel %vm405_vm3, %v925_v45, %v926_v47  ;;  %v2126_v11 = vsel %vm405_vm3, %v926_v47, %v928_v55  ;;  %v963_v45 = vrot.slane %v957_v34, 2  ;;  %v959_v47 = vmul.f32 %v956_v22, %v2069_v17 }
  0xe1   : > { %v2135_v9 = vsel %vm465_vm4, %v824_v10, %v825_v60  ;;  %v2142_v38 = vsel %vm405_vm3, %v904_v56, %v905_v8  ;;  %v2148_v39 = vsel %vm465_vm4, %v825_v60, %v827_v31  ;;  %v964_v10 = vrot.slane %v958_v37, 2 }
  0xe2   : > { %v2158_v48 = vmul.f32 %v2021_v53, %v1988_v40  ;;  %v978_v55 = vmul.f32 %v977_v19, %v2058_v6  ;;  %v853_v56 = vmul.f32 %v852_v61, %v2058_v6  ;;  %v987_v31 = vrot.slane %v980_v46, 2 }
  0xe3   : > { %v2165_v60 = vsel %vm465_vm4, %v963_v45, %v964_v10  ;;  %v400_v37 = vmul.f32 %v2046_v0, %v1988_v40  ;;  %v427_v61 = vsel %vm405_vm3, %v2809_v28, %v426_v44  ;;  %v868_v44 = vmul.f32 %v2808_v3, %v2079_v21 }
  0xe4   : > { %v984_v34 = vrot.slane %v978_v55, 2 }
  0xe5   : > { %v407_v55 = vrot.slane %v400_v37, 1  ;;  %v720_v37 = vstv %s2153_s10  ;;  %s2440_s10 = sld [smem:[#allocation11 + $0x1]] }
  0xe6   : > { %699 = vrot.lane.b32.xlu0 %v694_v57, %s1759_s27  ;;  %859 = vrot.lane.b32.xlu1 %v854_v42, %s1759_s27  ;;  %v2145_v57 = vsel %vm405_vm3, %v905_v8, %v907_v12  ;;  %v979_v42 = vmul.f32 %v977_v19, %v2079_v21  ;;  %v966_v8 = vrot.slane %v959_v47, 2  ;;  %v2170_v12 = vmul.f32 %v2021_v53, %v2040_v62 }
  0xe7   : > { %553 = vrot.lane.b32.xlu2 %v548_v23, %s1758_s11  ;;  %v2807_v23 = vrot.slane %v2086_v24, 2  ;;  %v401_v47 = vmul.f32 %v2046_v0, %v2040_v62  ;;  %v458_v0 = vstv %s2128_s0  ;;  %v723_v19 = vmul.f32 %v720_v37, %v1928_v16  ;;  %s1416_s0 = sld [smem:[#allocation7 + $0x180]] }
  0xe8   : > { %v985_v54 = vrot.slane %v979_v42, 2  ;;  %v2184_v45 = vsel %vm465_vm4, %v964_v10, %v966_v8  ;;  %v461_v8 = vmul.f32 %v458_v0, %v2040_v62 }
  0xe9   : > { %v485_v10 = vsel %vm465_vm4, %v483_v4, %v2807_v23  ;;  %v409_v20 = vrot.slane %v401_v47, 1  ;;  %v459_v4 = vmul.f32 %v458_v0, %v1953_v26  ;;  %v722_v47 = vmul.f32 %v720_v37, %v1924_v14 }
  0xea   : > { %v2181_v42 = vsel %vm465_vm4, %v985_v54, %v987_v31  ;;  %v2187_v46 = vsel %vm465_vm4, %v984_v34, %v985_v54  ;;  %v560_v54 = vstv %s2138_s16  ;;  %v2209_v31 = vsel %vm405_vm3, %v406_v29, %v407_v55  ;;  %s2438_s16 = sld [smem:[#allocation8]] }
  0xeb   : > { %2837 = vst [vmem:[#allocation25_spill] sm:$0xff] %v2187_v46  ;;  %v562_v34 = vmul.f32 %v560_v54, %v2016_v51  ;;  %v563_v49 = vmul.f32 %v560_v54, %v2054_v5  ;;  %v469_v29 = vrot.slane %v461_v8, 2  ;;  %v466_v22 = vrot.slane %v459_v4, 2 }
  0xec   : > { %v561_v28 = vmul.f32 %v560_v54, %v1968_v33  ;;  %v880_v46 = vstv %s2174_s6  ;;  %v619_v4 = vstv %s2192_s17  ;;  %s2442_s6 = sld [smem:[#allocation8 + $0x80]] }
  0xed   : > { %v568_v23 = vrot.slane %v562_v34, 1  ;;  %v570_v3 = vrot.slane %v563_v49, 1  ;;  %v881_v8 = vmul.f32 %v880_v46, %v2058_v6  ;;  %v882_v49 = vmul.f32 %v880_v46, %v2079_v21  ;;  %s2444_s17 = sld [smem:[#allocation11 + $0x2]] }
  0xee   : > { %857 = vrot.lane.b32.xlu0 %v853_v56, %s1759_s27  ;;  %430 = vrot.lane.b32.xlu1 %v427_v61, %s1759_s27  ;;  %v460_v56 = vmul.f32 %v458_v0, %v1988_v40  ;;  %v728_v0 = vrot.slane %v722_v47, 1  ;;  %v567_v34 = vrot.slane %v561_v28, 1 }
  0xef   : > { %697 = vrot.lane.b32.xlu2 %v2033_v58, %s1759_s27  ;;  %v2220_v58 = vsel %vm405_vm3, %v407_v55, %v409_v20  ;;  %v2232_v55 = vsel %vm405_vm3, %v568_v23, %v570_v3  ;;  %v887_v54 = vrot.slane %v881_v8, 1  ;;  %v779_v8 = vstv %s2217_s26  ;;  %s2446_s26 = sld [smem:[#allocation8 + $0x100]] }
  0xf0   : > { %v467_v61 = vrot.slane %v460_v56, 2  ;;  %v730_v56 = vrot.slane %v723_v19, 1  ;;  %v622_v19 = vmul.f32 %v619_v4, %v2054_v5  ;;  %v2251_v28 = vsel %vm405_vm3, %v567_v34, %v568_v23 }
  0xf1   : > { %v781_v23 = vmul.f32 %v779_v8, %v1924_v14 }
  0xf2   : > { %v2225_v7 = vsel %vm465_vm4, %v467_v61, %v469_v29  ;;  %v2235_v20 = vsel %vm465_vm4, %v466_v22, %v467_v61  ;;  %v721_v29 = vmul.f32 %v720_v37, %v1922_v13  ;;  %v2244_v3 = vsel %vm405_vm3, %v728_v0, %v730_v56 }
  0xf3   : > { %2838 = vst [vmem:[#allocation26_spill] sm:$0xff] %v2225_v7  ;;  %v621_v22 = vmul.f32 %v619_v4, %v2016_v51  ;;  %v888_v61 = vrot.slane %v882_v49, 1  ;;  %v883_v56 = vmul.f32 %v880_v46, %v2069_v17  ;;  %v780_v46 = vmul.f32 %v779_v8, %v1922_v13 }
  0xf4   : > { %2839 = vst [vmem:[#allocation27_spill] sm:$0xff] %v2235_v20  ;;  %v727_v37 = vrot.slane %v721_v29, 1  ;;  %v2841_v29 = vrot.slane %v2050_v2, 1  ;;  %v2844_v2 = vrot.slane %v2099_v30, 2 }
  0xf5   : > { %v627_v47 = vrot.slane %v621_v22, 2  ;;  %v2257_v7 = vsel %vm405_vm3, %v887_v54, %v888_v61  ;;  %v890_v49 = vrot.slane %v883_v56, 1  ;;  %v2842_v54 = vrot.slane %v2019_v52, 1 }
  0xf6   : > { %873 = vrot.lane.b32.xlu0 %v868_v44, %s1758_s11  ;;  %488 = vrot.lane.b32.xlu1 %v485_v10, %s1759_s27  ;;  %v620_v44 = vmul.f32 %v619_v4, %v1968_v33  ;;  %v629_v10 = vrot.slane %v622_v19, 2  ;;  %v2260_v20 = vsel %vm405_vm3, %v727_v37, %v728_v0  ;;  %v782_v4 = vmul.f32 %v779_v8, %v1928_v16 }
  0xf7   : > { %713 = vrot.lane.b32.xlu2 %v2043_v63, %s1758_s11  ;;  %v425_v0 = vsel %vm405_vm3, %v2842_v54, %v2841_v29  ;;  %v787_v19 = vrot.slane %v781_v23, 2  ;;  %v939_v37 = vstv %s2229_s24  ;;  %v786_v56 = vrot.slane %v780_v46, 2  ;;  %s2449_s24 = sld [smem:[#allocation11 + $0x3]] }
  0xf8   : > { %v626_v63 = vrot.slane %v620_v44, 2  ;;  %v2266_v34 = vsel %vm465_vm4, %v627_v47, %v629_v10  ;;  %v2280_v44 = vsel %vm405_vm3, %v888_v61, %v890_v49  ;;  %v789_v10 = vrot.slane %v782_v4, 2 }
  0xf9   : > { %2840 = vst [vmem:[#allocation28_spill] sm:$0xff] %v2266_v34  ;;  %v940_v34 = vmul.f32 %v939_v37, %v2058_v6  ;;  %v2843_v8 = vrot.slane %v2103_v32, 2  ;;  %v2845_v29 = vstv %s1996_s15  ;;  %v2299_v32 = vsel %vm465_vm4, %v786_v56, %v787_v19  ;;  %s1410_s15 = sld [smem:[#allocation7 + $0x104]] }
  0xfa   : > { %v2276_v22 = vsel %vm465_vm4, %v626_v63, %v627_v47  ;;  %v867_v54 = vmul.f32 %v2845_v29, %v2058_v6  ;;  %v941_v47 = vmul.f32 %v939_v37, %v2079_v21  ;;  %v942_v63 = vmul.f32 %v939_v37, %v2069_v17 }
  0xfb   : > { %v508_v52 = vsel %vm465_vm4, %v2844_v2, %v2843_v8  ;;  %v2296_v61 = vsel %vm465_vm4, %v787_v19, %v789_v10  ;;  %v946_v23 = vrot.slane %v940_v34, 2  ;;  %v445_v46 = vrot.slane %v2158_v48, 1 }
  0xfc   : > { %v947_v49 = vrot.slane %v941_v47, 2  ;;  %v949_v4 = vrot.slane %v942_v63, 2  ;;  %v585_v17 = vrot.slane %v2090_v25, 1  ;;  %v447_v37 = vrot.slane %v2170_v12, 1 }
  0xfd   : > { %v587_v10 = vrot.slane %v2094_v27, 1  ;;  %v636_v19 = vstv %s2263_s29  ;;  %v479_v2 = vmul.f32 %v1999_v43, %v2040_v62  ;;  %v657_v63 = vstv %s1404_s13  ;;  %s2451_s29 = sld [smem:[#allocation8 + $0x180]] }
  0xfe   : > { %428 = vrot.lane.b32.xlu0 %v425_v0, %s1759_s27  ;;  %511 = vrot.lane.b32.xlu1 %v508_v52, %s1758_s11  ;;  %v438_v0 = vmul.f32 %v2021_v53, %v1953_v26  ;;  %v2309_v8 = vsel %vm465_vm4, %v946_v23, %v947_v49  ;;  %v2312_v34 = vsel %vm465_vm4, %v947_v49, %v949_v4  ;;  %v598_v49 = vstv %s1401_s14  ;;  %s2453_s13 = sld [smem:[#allocation11 + $0x4]] }
  0xff   : > { %871 = vrot.lane.b32.xlu2 %v867_v54, %s1758_s11  ;;  %v448_v48 = vsel %vm405_vm3, %v445_v46, %v447_v37  ;;  %v588_v25 = vsel %vm405_vm3, %v585_v17, %v587_v10  ;;  %v637_v53 = vmul.f32 %v636_v19, %v1968_v33  ;;  %v638_v12 = vmul.f32 %v636_v19, %v2016_v51  ;;  %s2455_s14 = sld [smem:[#allocation8 + $0x200]] }
 0x100   : > { %v444_v56 = vrot.slane %v438_v0, 1  ;;  %v498_v52 = vmul.f32 %v2014_v50, %v1953_v26  ;;  %v486_v47 = vrot.slane %v479_v2, 2  ;;  %v578_v4 = vmul.f32 %v2036_v59, %v1968_v33 }
 0x101   : > { %v643_v29 = vrot.slane %v637_v53, 2  ;;  %v644_v54 = vrot.slane %v638_v12, 2  ;;  %v659_v62 = vmul.f32 %v657_v63, %v2016_v51  ;;  %v660_v50 = vmul.f32 %v657_v63, %v2054_v5 }
 0x102   : > { %v446_v27 = vsel %vm405_vm3, %v444_v56, %v445_v46  ;;  %v504_v23 = vrot.slane %v498_v52, 2  ;;  %v2846_v46 = vrot.slane %v2099_v30, 2  ;;  %v2847_v37 = vrot.slane %v2086_v24, 2 }
 0x103   : > { %v645_v43 = vsel %vm465_vm4, %v643_v29, %v644_v54  ;;  %v599_v59 = vmul.f32 %v598_v49, %v1968_v33  ;;  %v600_v30 = vmul.f32 %v598_v49, %v2016_v51  ;;  %v584_v56 = vrot.slane %v578_v4, 1 }
 0x104   : > { %v506_v0 = vsel %vm465_vm4, %v504_v23, %v2846_v46  ;;  %v487_v10 = vsel %vm465_vm4, %v2847_v37, %v486_v47  ;;  %v737_v53 = vstv %s1410_s15  ;;  %v601_v29 = vmul.f32 %v598_v49, %v2054_v5  ;;  %s2457_s15 = sld [smem:[#allocation11 + $0x5]] }
 0x105   : > { %v605_v12 = vrot.slane %v599_v59, 1  ;;  %v738_v2 = vmul.f32 %v737_v53, %v1922_v13  ;;  %v586_v52 = vsel %vm405_vm3, %v584_v56, %v585_v17  ;;  %v739_v47 = vmul.f32 %v737_v53, %v1924_v14 }
 0x106   : > { %451 = vrot.lane.b32.xlu0 %v448_v48, %s1758_s11  ;;  %591 = vrot.lane.b32.xlu1 %v588_v25, %s1759_s27  ;;  %v665_v48 = vrot.slane %v659_v62, 2  ;;  %v667_v25 = vrot.slane %v660_v50, 2  ;;  %v639_v4 = vmul.f32 %v636_v19, %v2054_v5  ;;  %v608_v46 = vrot.slane %v601_v29, 1 }
 0x107   : > { %449 = vrot.lane.b32.xlu2 %v446_v27, %s1758_s11  ;;  %v606_v27 = vrot.slane %v600_v30, 1  ;;  %v658_v50 = vmul.f32 %v657_v63, %v1968_v33  ;;  %v761_v37 = vmul.f32 %v1926_v15, %v1928_v16  ;;  %v740_v19 = vmul.f32 %v737_v53, %v1928_v16 }
 0x108   : > { %v668_v24 = vsel %vm465_vm4, %v665_v48, %v667_v25  ;;  %v646_v17 = vrot.slane %v639_v4, 2  ;;  %v364_v56 = vstv %s2353_s8  ;;  %v2848_v63 = vrot.slane %v1936_v18, 1  ;;  %s2460_s8 = sld [smem:[#allocation8 + $0x280]] }
 0x109   : > { %v607_v23 = vsel %vm405_vm3, %v605_v12, %v606_v27  ;;  %v609_v49 = vsel %vm405_vm3, %v606_v27, %v608_v46  ;;  %v768_v59 = vrot.slane %v761_v37, 1  ;;  %v747_v30 = vrot.slane %v740_v19, 1 }
 0x10a   : > { %v647_v5 = vsel %vm465_vm4, %v644_v54, %v646_v17  ;;  %v365_v16 = vmul.f32 %v364_v56, %v1953_v26 }
 0x10b   : > { %v769_v15 = vsel %vm405_vm3, %v2848_v63, %v768_v59 }
 0x10e   : > { %509 = vrot.lane.b32.xlu0 %v506_v0, %s1758_s11  ;;  %648 = vrot.lane.b32.xlu1 %v645_v43, %s1759_s27  ;;  %v744_v0 = vrot.slane %v738_v2, 1  ;;  %v745_v43 = vrot.slane %v739_v47, 1  ;;  %v2849_v47 = vld [vmem:[#allocation25_spill] sm:$0xff] }
 0x10f   : > { %490 = vrot.lane.b32.xlu2 %v487_v10, %s1759_s27  ;;  %v664_v10 = vrot.slane %v658_v50, 2 }
 0x110   : > { %v746_v62 = vsel %vm405_vm3, %v744_v0, %v745_v43  ;;  %v748_v54 = vsel %vm405_vm3, %v745_v43, %v747_v30  ;;  %v846_v43 = vstv %s1416_s0  ;;  %s2466_s0 = sld [smem:[#allocation11 + $0x7]] }
 0x111   : > { %v666_v25 = vsel %vm465_vm4, %v664_v10, %v665_v48  ;;  %v526_v48 = vstv %s2375_s7  ;;  %v847_v10 = vmul.f32 %v846_v43, %v2058_v6  ;;  %s2462_s7 = sld [smem:[#allocation11 + $0x6]] }
 0x112   : > { %v527_v26 = vmul.f32 %v526_v48, %v1968_v33  ;;  %v686_v33 = vstv %s2391_s9  ;;  %s2464_s9 = sld [smem:[#allocation8 + $0x300]] }
 0x113   : > { %v688_v17 = vmul.f32 %v686_v33, %v1924_v14 }
 0x116   : > { %589 = vrot.lane.b32.xlu0 %v586_v52, %s1759_s27  ;;  %671 = vrot.lane.b32.xlu1 %v668_v24, %s1758_s11 }
 0x117   : > { %610 = vrot.lane.b32.xlu2 %v607_v23, %s1758_s11 }
 0x11e   : > { %612 = vrot.lane.b32.xlu0 %v609_v49, %s1758_s11  ;;  %749 = vrot.lane.b32.xlu1 %v746_v62, %s1759_s27  ;;  %v848_v49 = vmul.f32 %v846_v43, %v2079_v21  ;;  %v1152_v43 = vstv %s2457_s15 }
 0x11f   : > { %650 = vrot.lane.b32.xlu2 %v647_v5, %s1759_s27 }
 0x126   : > { %669 = vrot.lane.b32.xlu0 %v666_v25, %s1758_s11  ;;  %772 = vrot.lane.b32.xlu1 %v769_v15, %s1758_s11 }
 0x127   : > { %751 = vrot.lane.b32.xlu2 %v748_v54, %s1759_s27 }
 0x128   : > { %v376_v53 = vpop.permute.xlu2 %375 }
 0x129   : > { %v381_v12 = vadd.f32 %v376_v53, %v365_v16 }
 0x12e   : > { %770 = vrot.lane.b32.xlu0 %v1974_v35, %s1758_s11  ;;  %930 = vrot.lane.b32.xlu1 %v2123_v1, %s1758_s11 }
 0x12f   : > { %909 = vrot.lane.b32.xlu2 %v2142_v38, %s1759_s27 }
 0x131   : > { %v392_v18 = vpop.permute.xlu2 %391 }
 0x136   : > { %911 = vrot.lane.b32.xlu0 %v2145_v57, %s1759_s27  ;;  %810 = vrot.lane.b32.xlu1 %v1981_v36, %s1759_s27 }
 0x137   : > { %932 = vrot.lane.b32.xlu2 %v2126_v11, %s1758_s11 }
 0x139   : > { %v538_v35 = vpop.permute.xlu2 %537 }
 0x13a   : > { %v543_v27 = vadd.f32 %v538_v35, %v527_v26 }
 0x13e   : > { %808 = vrot.lane.b32.xlu0 %v2112_v41, %s1759_s27  ;;  %968 = vrot.lane.b32.xlu1 %v2165_v60, %s1759_s27  ;;  %v366_v41 = vmul.f32 %v364_v56, %v1988_v40 }
 0x13f   : > { %829 = vrot.lane.b32.xlu2 %v2135_v9, %s1758_s11  ;;  %v687_v9 = vmul.f32 %v686_v33, %v1922_v13 }
 0x140   : > { %v390_v36 = vpop.permute.xlu1 %389 }
 0x141   : > { %v395_v1 = vadd.f32 %v390_v36, %v381_v12  ;;  %v554_v38 = vpop.permute.xlu2 %553 }
 0x143   : > { %v413_v11 = vadd.f32 %v2209_v31, %v395_v1  ;;  %v2851_v1 = vld [vmem:[#allocation26_spill] sm:$0xff] }
 0x146   : > { %831 = vrot.lane.b32.xlu0 %v2148_v39, %s1758_s11  ;;  %991 = vrot.lane.b32.xlu1 %v2181_v42, %s1758_s11  ;;  %v528_v42 = vmul.f32 %v526_v48, %v2016_v51 }
 0x147   : > { %970 = vrot.lane.b32.xlu2 %v2184_v45, %s1759_s27  ;;  %s2436_s27 = sld [smem:[#allocation11]] }
 0x148   : > { %v378_v57 = vpop.permute.xlu0 %377  ;;  %v552_v60 = vpop.permute.xlu1 %551 }
 0x149   : > { %v382_v2 = vadd.f32 %v378_v57, %v366_v41  ;;  %v557_v52 = vadd.f32 %v552_v60, %v543_v27  ;;  %v698_v24 = vpop.permute.xlu2 %697 }
 0x14a   : > { %v703_v31 = vadd.f32 %v698_v24, %v687_v9  ;;  %v1032_v24 = vstv %s2440_s10  ;;  %s2637_s10 = sld [smem:[#allocation8 + $0x183]] }
 0x14b   : > { %v396_v29 = vadd.f32 %v392_v18, %v382_v2  ;;  %v2414_v45 = vadd.f32 %v2251_v28, %v557_v52  ;;  %v1005_v52 = vstv %s2438_s16  ;;  %s2635_s16 = sld [smem:[#allocation8 + $0x103]] }
 0x14d   : > { %v414_v39 = vadd.f32 %v2220_v58, %v396_v29  ;;  %v1002_v2 = vstv %s2436_s27  ;;  %s2633_s27 = sld [smem:[#allocation8 + $0x83]] }
 0x14e   : > { %989 = vrot.lane.b32.xlu0 %v2849_v47, %s1758_s11  ;;  %s2431_s11 = sld [smem:[#allocation10]]  ;;  %v1062_v47 = vstv %s2444_s17 }
 0x14f   : > { %s2645_s17 = sld [smem:[#allocation8 + $0x283]] }
 0x150   : > { %v540_v40 = vpop.permute.xlu0 %539  ;;  %v712_v23 = vpop.permute.xlu1 %711 }
 0x151   : > { %v544_v4 = vadd.f32 %v540_v40, %v528_v42  ;;  %v717_v13 = vadd.f32 %v712_v23, %v703_v31  ;;  %v714_v46 = vpop.permute.xlu2 %713  ;;  %v1065_v42 = vstv %s2446_s26  ;;  %v1092_v23 = vstv %s2449_s24  ;;  %s2650_s26 = sld [smem:[#allocation8 + $0x303]] }
 0x152   : > { %s2656_s24 = sld [smem:[#allocation8 + $0x383]] }
 0x153   : > { %v558_v0 = vadd.f32 %v554_v38, %v544_v4  ;;  %v2419_v58 = vadd.f32 %v2260_v20, %v717_v13  ;;  %v1095_v4 = vstv %s2451_s29  ;;  %v1122_v13 = vstv %s2453_s13  ;;  %s1387_s29 = sshll.u32 %s1894_s12, 7 }
 0x154   : > { %v518_v9 = vstv %s2431_s11  ;;  %s2631_s11 = sld [smem:[#allocation8 + $0x3]]  ;;  %s2712_s13 = scalar_lea.vmem [#allocation13], %s1387_s29 }
 0x155   : > { %v2422_v51 = vadd.f32 %v2232_v55, %v558_v0  ;;  %v1125_v0 = vstv %s2455_s14  ;;  %s1484_s14 = sshll.u32 %s1813_s22, 7 }
 0x158   : > { %v700_v62 = vpop.permute.xlu0 %699  ;;  %v860_v50 = vpop.permute.xlu1 %859 }
 0x159   : > { %v704_v28 = vadd.f32 %v700_v62, %v688_v17  ;;  %v864_v37 = vadd.f32 %v860_v50, %v848_v49  ;;  %v872_v5 = vpop.permute.xlu2 %871  ;;  %v1155_v17 = vstv %s2460_s8  ;;  %v1182_v62 = vstv %s2462_s7  ;;  %s1253_s8 = scalar_lea.hbm %s2805_s5, %s1484_s14  ;;  %s1254_s7 = sshll.u32 %s2712_s13, 4  ;;  %s1255_s7 = int_to_ptr.vmem [resolvable:$true] %s1254_s7 }
 0x15a   : > { %v1185_v50 = vstv %s2464_s9  ;;  %s1256_s9 = sshll.u32 %s1253_s8, 4  ;;  %s1257_s9 = int_to_ptr.hbm [resolvable:$true] %s1256_s9 }
 0x15b   : > { %v718_v19 = vadd.f32 %v714_v46, %v704_v28  ;;  %v1212_v28 = vstv %s2466_s0  ;;  %s1242_s0 = scalar_lea.sflag [#allocation5], %s1894_s12 }
 0x15d   : > { %v2426_v21 = vadd.f32 %v2244_v3, %v718_v19  ;;  %v1215_v19 = vstv %s2468_s1  ;;  %s2582_s1 = sld [smem:[#allocation10 + $0x2]] }
 0x160   : > { %v858_v59 = vpop.permute.xlu0 %857  ;;  %v431_v30 = vpop.permute.xlu1 %430 }
 0x161   : > { %v863_v56 = vadd.f32 %v858_v59, %v847_v10  ;;  %v435_v14 = vadd.f32 %v431_v30, %v414_v39  ;;  %v450_v25 = vpop.permute.xlu2 %449  ;;  %v1035_v39 = vstv %s2442_s6  ;;  %v678_v59 = vstv %s2472_s2  ;;  %s2587_s2 = sld [smem:[#allocation8 + $0x2]] }
 0x162   : > { %v1011_v30 = vstv %s2474_s3  ;;  %s2589_s3 = sld [smem:[#allocation8 + $0x82]] }
 0x163   : > { %v877_v20 = vadd.f32 %v872_v5, %v863_v56  ;;  %v1041_v56 = vstv %s2478_s4  ;;  %s2607_s4 = sld [smem:[#allocation8 + $0x102]] }
 0x164   : > { %s2640_s6 = sld [smem:[#allocation8 + $0x203]] }
 0x165   : > { %v2429_v55 = vadd.f32 %v2257_v7, %v877_v20  ;;  %v2850_v7 = vld [vmem:[#allocation27_spill] sm:$0xff] }
 0x168   : > { %v874_v63 = vpop.permute.xlu0 %873  ;;  %v489_v15 = vpop.permute.xlu1 %488 }
 0x169   : > { %v878_v54 = vadd.f32 %v874_v63, %v864_v37  ;;  %v491_v16 = vpop.permute.xlu2 %490 }
 0x16b   : > { %v2434_v6 = vadd.f32 %v2280_v44, %v878_v54  ;;  %v1161_v54 = vstv %s2486_s23  ;;  %s2626_s23 = sld [smem:[#allocation8 + $0x382]] }
 0x170   : > { %v429_v53 = vpop.permute.xlu0 %428  ;;  %v512_v12 = vpop.permute.xlu1 %511 }
 0x171   : > { %v434_v3 = vadd.f32 %v429_v53, %v413_v11  ;;  %v611_v44 = vpop.permute.xlu2 %610 }
 0x173   : > { %v455_v18 = vadd.f32 %v450_v25, %v434_v3 }
 0x175   : > { %v473_v48 = vadd.f32 %v2850_v7, %v455_v18  ;;  %v1191_v18 = vstv %s2488_s21  ;;  %v1221_v7 = vstv %s2496_s25  ;;  %s2622_s21 = sld [smem:[#allocation8 + $0x282]] }
 0x176   : > { %s2624_s25 = sld [smem:[#allocation8 + $0x302]] }
 0x177   : > { %v494_v26 = vadd.f32 %v489_v15, %v473_v48  ;;  %v1131_v15 = vstv %s2484_s19  ;;  %s2614_s19 = sld [smem:[#allocation8 + $0x182]] }
 0x178   : > { %v452_v35 = vpop.permute.xlu0 %451  ;;  %v592_v27 = vpop.permute.xlu1 %591 }
 0x179   : > { %v456_v36 = vadd.f32 %v452_v35, %v435_v14  ;;  %v2476_v60 = vpop.permute.xlu2 %650  ;;  %v1101_v14 = vstv %s2482_s20  ;;  %v596_v25 = vadd.f32 %v592_v27, %v2422_v51  ;;  %s2620_s20 = sld [smem:[#allocation8 + $0x202]] }
 0x17b   : > { %v474_v38 = vadd.f32 %v2851_v1, %v456_v36 }
 0x17d   : > { %v495_v11 = vadd.f32 %v491_v16, %v474_v38 }
 0x17f   : > { %v516_v33 = vadd.f32 %v512_v12, %v495_v11 }
 0x180   : > { %v510_v41 = vpop.permute.xlu0 %509  ;;  %v2470_v57 = vpop.permute.xlu1 %648 }
 0x181   : > { %v515_v40 = vadd.f32 %v510_v41, %v494_v26  ;;  %v520_v49 = vadd.f32 %v518_v9, %v516_v33  ;;  %v752_v37 = vpop.permute.xlu2 %751  ;;  %v2852_v33 = vld [vmem:[#allocation28_spill] sm:$0xff] }
 0x182   : > { %v756_v26 = vadd.f32 %v752_v37, %v2426_v21 }
 0x183   : > { %v519_v10 = vadd.f32 %v518_v9, %v515_v40  ;;  %v1007_v63 = vmul.f32 %v1005_v52, %v520_v49  ;;  %v1037_v16 = vmul.f32 %v1035_v39, %v520_v49  ;;  %v1067_v53 = vmul.f32 %v1065_v42, %v520_v49 }
 0x184   : > { %v1127_v1 = vmul.f32 %v1125_v0, %v520_v49  ;;  %v1157_v38 = vmul.f32 %v1155_v17, %v520_v49 }
 0x185   : > { %v1006_v48 = vmul.f32 %v1005_v52, %v519_v10  ;;  %v1036_v36 = vmul.f32 %v1035_v39, %v519_v10  ;;  %v2524_v11 = vadd.f32 %v1007_v63, %v1002_v2  ;;  %v1066_v51 = vmul.f32 %v1065_v42, %v519_v10 }
 0x186   : > { %v1096_v27 = vmul.f32 %v1095_v4, %v519_v10  ;;  %v2527_v9 = vadd.f32 %v1037_v16, %v1032_v24  ;;  %v1126_v40 = vmul.f32 %v1125_v0, %v519_v10  ;;  %v1156_v52 = vmul.f32 %v1155_v17, %v519_v10 }
 0x187   : > { %v1186_v21 = vmul.f32 %v1185_v50, %v519_v10  ;;  %v1038_v37 = vadd.f32 %v1036_v36, %v1032_v24  ;;  %v1216_v63 = vmul.f32 %v1215_v19, %v519_v10  ;;  %v1217_v42 = vmul.f32 %v1215_v19, %v520_v49 }
 0x188   : > { %v590_v31 = vpop.permute.xlu0 %589  ;;  %v2494_v29 = vpop.permute.xlu1 %671  ;;  %v1128_v0 = vadd.f32 %v1126_v40, %v1122_v13  ;;  %v1159_v17 = vadd.f32 %v1157_v38, %v1152_v43 }
 0x189   : > { %v595_v46 = vadd.f32 %v590_v31, %v2414_v45  ;;  %v1071_v45 = vstv %s2480_s28  ;;  %v2529_v31 = vadd.f32 %v1067_v53, %v1062_v47  ;;  %s2629_s28 = sld [smem:[#allocation10 + $0x3]] }
 0x18b   : > { %v616_v5 = vadd.f32 %v611_v44, %v595_v46  ;;  %v1097_v44 = vmul.f32 %v1095_v4, %v520_v49  ;;  %v1008_v46 = vadd.f32 %v1006_v48, %v1002_v2  ;;  %v910_v4 = vpop.permute.xlu2 %909  ;;  %v1158_v2 = vadd.f32 %v1156_v52, %v1152_v43 }
 0x18d   : > { %v633_v20 = vadd.f32 %v2276_v22, %v616_v5  ;;  %v1187_v22 = vmul.f32 %v1185_v50, %v520_v49  ;;  %v2531_v5 = vadd.f32 %v1097_v44, %v1092_v23  ;;  %v1188_v49 = vadd.f32 %v1186_v21, %v1182_v62 }
 0x18f   : > { %v654_v16 = vadd.f32 %v2470_v57, %v633_v20 }
 0x190   : > { %v613_v12 = vpop.permute.xlu0 %612  ;;  %v750_v3 = vpop.permute.xlu1 %749 }
 0x191   : > { %v617_v35 = vadd.f32 %v613_v12, %v596_v25  ;;  %v2534_v25 = vadd.f32 %v1127_v1, %v1122_v13  ;;  %v1068_v12 = vadd.f32 %v1066_v51, %v1062_v47  ;;  %v915_v47 = vadd.f32 %v910_v4, %v2429_v55 }
 0x192   : > { %v1219_v13 = vadd.f32 %v1217_v42, %v1212_v28  ;;  %v755_v43 = vadd.f32 %v750_v3, %v2419_v58 }
 0x193   : > { %v634_v41 = vadd.f32 %v2852_v33, %v617_v35  ;;  %v1098_v35 = vadd.f32 %v1096_v27, %v1092_v23  ;;  %v1218_v23 = vadd.f32 %v1216_v63, %v1212_v28  ;;  %v933_v40 = vpop.permute.xlu2 %932 }
 0x195   : > { %v655_v39 = vadd.f32 %v2476_v60, %v634_v41  ;;  %v1189_v60 = vadd.f32 %v1187_v22, %v1182_v62 }
 0x197   : > { %v676_v53 = vadd.f32 %v2494_v29, %v655_v39 }
 0x198   : > { %v670_v24 = vpop.permute.xlu0 %669  ;;  %v773_v50 = vpop.permute.xlu1 %772 }
 0x199   : > { %v675_v57 = vadd.f32 %v670_v24, %v654_v16  ;;  %v680_v29 = vadd.f32 %v678_v59, %v676_v53  ;;  %v777_v19 = vadd.f32 %v773_v50, %v756_v26  ;;  %v1077_v50 = vstv %s2607_s4 }
 0x19b   : > { %v679_v10 = vadd.f32 %v678_v59, %v675_v57  ;;  %v1013_v20 = vmul.f32 %v1011_v30, %v680_v29  ;;  %v1043_v62 = vmul.f32 %v1041_v56, %v680_v29  ;;  %v1073_v55 = vmul.f32 %v1071_v45, %v680_v29 }
 0x19c   : > { %v1103_v48 = vmul.f32 %v1101_v14, %v680_v29  ;;  %v1133_v44 = vmul.f32 %v1131_v15, %v680_v29  ;;  %v1163_v36 = vmul.f32 %v1161_v54, %v680_v29  ;;  %v1193_v1 = vmul.f32 %v1191_v18, %v680_v29 }
 0x19d   : > { %v1012_v28 = vmul.f32 %v1011_v30, %v679_v10  ;;  %v1042_v58 = vmul.f32 %v1041_v56, %v679_v10  ;;  %v1072_v59 = vmul.f32 %v1071_v45, %v679_v10  ;;  %v1102_v3 = vmul.f32 %v1101_v14, %v679_v10 }
 0x19e   : > { %v1132_v26 = vmul.f32 %v1131_v15, %v679_v10  ;;  %v1162_v38 = vmul.f32 %v1161_v54, %v679_v10  ;;  %v1192_v22 = vmul.f32 %v1191_v18, %v679_v10  ;;  %v1222_v51 = vmul.f32 %v1221_v7, %v679_v10 }
 0x19f   : > { %v2566_v27 = vadd.f32 %v1012_v28, %v1008_v46  ;;  %v2568_v33 = vadd.f32 %v1042_v58, %v1038_v37  ;;  %v2570_v41 = vadd.f32 %v1072_v59, %v1068_v12  ;;  %v2572_v30 = vadd.f32 %v1102_v3, %v1098_v35 }
 0x1a0   : > { %v2574_v56 = vadd.f32 %v1132_v26, %v1128_v0  ;;  %v2576_v45 = vadd.f32 %v1162_v38, %v1158_v2  ;;  %v2578_v14 = vadd.f32 %v1192_v22, %v1188_v49  ;;  %v1223_v15 = vmul.f32 %v1221_v7, %v680_v29  ;;  %v771_v54 = vpop.permute.xlu0 %770  ;;  %v931_v18 = vpop.permute.xlu1 %930 }
 0x1a1   : > { %v2584_v52 = vadd.f32 %v1222_v51, %v1218_v23  ;;  %v776_v46 = vadd.f32 %v771_v54, %v755_v43  ;;  %v936_v21 = vadd.f32 %v931_v18, %v915_v47  ;;  %v794_v39 = vadd.f32 %v2296_v61, %v777_v19 }
 0x1a2   : > { %v2592_v37 = vadd.f32 %v1013_v20, %v2524_v11  ;;  %v2595_v7 = vadd.f32 %v1043_v62, %v2527_v9  ;;  %v2598_v63 = vadd.f32 %v1073_v55, %v2529_v31  ;;  %v2601_v42 = vadd.f32 %v1103_v48, %v2531_v5 }
 0x1a3   : > { %v793_v4 = vadd.f32 %v2299_v32, %v776_v46  ;;  %v2605_v61 = vadd.f32 %v2309_v8, %v936_v21  ;;  %v2610_v12 = vadd.f32 %v1133_v44, %v2534_v25  ;;  %v2612_v11 = vadd.f32 %v1163_v36, %v1159_v17  ;;  %v830_v25 = vpop.permute.xlu2 %829 }
 0x1a4   : > { %v2616_v9 = vadd.f32 %v1193_v1, %v1189_v60  ;;  %v2618_v31 = vadd.f32 %v1223_v15, %v1219_v13  ;;  %v838_v2 = vstv %s2582_s1  ;;  %v1017_v17 = vstv %s2587_s2  ;;  %s1684_s1 = sshra.s32 %s1257_s9, 4  ;;  %s1685_s1 = int_to_ptr.hbm [resolvable:$true] %s1684_s1 }
 0x1a5   : > { %v1047_v60 = vstv %s2589_s3  ;;  %v1137_v49 = vstv %s2620_s20  ;;  %v1167_v47 = vstv %s2622_s21  ;;  %v1197_v57 = vstv %s2624_s25  ;;  %s1686_s2 = scalar_lea.hbm %s1685_s1, 128  ;;  %p1691_p9 = scmp.lt.s32.totalorder %s1685_s1, %s2805_s5 }
 0x1a6   : > { %v1227_v29 = vstv %s2626_s23  ;;  %v998_v23 = vstv %s2629_s28  ;;  %v1023_v19 = vstv %s2631_s11  ;;  %v1053_v10 = vstv %s2633_s27  ;;  %p1687_p1 = scmp.ne.s32.totalorder %s1685_s1, %s1686_s2 }
 0x1a7   : > { %v1083_v20 = vstv %s2635_s16  ;;  %v1113_v55 = vstv %s2637_s10  ;;  %v1143_v48 = vstv %s2640_s6 }
 0x1a8   : > { %v912_v32 = vpop.permute.xlu0 %911  ;;  %v811_v8 = vpop.permute.xlu1 %810  ;;  %p1688_p4 = pnand %p1687_p1, %p1867_p5 }
 0x1a9   : > { %v916_v5 = vadd.f32 %v912_v32, %v2434_v6  ;;  %v815_v62 = vadd.f32 %v811_v8, %v794_v39  ;;  %v1173_v8 = vstv %s2645_s17 }
 0x1aa   : > { %p1689_p8 = pneg %p1688_p4 }
 0x1ab   : > { %v937_v35 = vadd.f32 %v933_v40, %v916_v5  ;;  %v971_v13 = vpop.permute.xlu2 %970  ;;  %v1203_v5 = vstv %s2650_s26 }
 0x1ad   : > { %v954_v16 = vadd.f32 %v2312_v34, %v937_v35  ;;  %v1107_v34 = vstv %s2614_s19  ;;  %s1690_s19 = scalar_lea.hbm %s2805_s5, 256 }
 0x1ae   : > { %p1692_p10 = scmp.lt.s32.totalorder %s1690_s19, %s1686_s2 }
 0x1af   : > { %v975_v44 = vadd.f32 %v971_v13, %v954_v16 }
 0x1b0   : > { %v809_v6 = vpop.permute.xlu0 %808  ;;  %v969_v53 = vpop.permute.xlu1 %968  ;;  %p1693_p2 = por %p1692_p10, %p1691_p9 }
 0x1b1   : > { %v814_v0 = vadd.f32 %v809_v6, %v793_v4 }
 0x1b2   : > { %p1694_p11 = pnand %p1693_p2, %p1689_p8 }
 0x1b3   : > { %v835_v24 = vadd.f32 %v830_v25, %v814_v0 }
 0x1b5   : > { %v839_v43 = vadd.f32 %v838_v2, %v835_v24 }
 0x1b7   : > { %v1018_v36 = vmul.f32 %v1017_v17, %v839_v43  ;;  %v1048_v1 = vmul.f32 %v1047_v60, %v839_v43  ;;  %v1078_v28 = vmul.f32 %v1077_v50, %v839_v43  ;;  %v1108_v58 = vmul.f32 %v1107_v34, %v839_v43 }
 0x1b8   : > { %v832_v59 = vpop.permute.xlu0 %831  ;;  %v1138_v3 = vmul.f32 %v1137_v49, %v839_v43  ;;  %v1168_v26 = vmul.f32 %v1167_v47, %v839_v43  ;;  %v1198_v38 = vmul.f32 %v1197_v57, %v839_v43  ;;  %v1228_v22 = vmul.f32 %v1227_v29, %v839_v43  ;;  %v992_v51 = vpop.permute.xlu1 %991 }
 0x1b9   : > { %v836_v15 = vadd.f32 %v832_v59, %v815_v62  ;;  %v996_v54 = vadd.f32 %v992_v51, %v975_v44  ;;  %v2664_v18 = vadd.f32 %v1018_v36, %v2566_v27  ;;  %v2667_v40 = vadd.f32 %v1048_v1, %v2568_v33 }
 0x1ba   : > { %v2670_v46 = vadd.f32 %v1078_v28, %v2570_v41  ;;  %v2673_v21 = vadd.f32 %v1108_v58, %v2572_v30  ;;  %v2676_v39 = vadd.f32 %v1138_v3, %v2574_v56  ;;  %v2679_v4 = vadd.f32 %v1168_v26, %v2576_v45 }
 0x1bb   : > { %v840_v32 = vadd.f32 %v838_v2, %v836_v15  ;;  %v2683_v27 = vadd.f32 %v1198_v38, %v2578_v14  ;;  %v2686_v33 = vadd.f32 %v1228_v22, %v2584_v52  ;;  %v974_v41 = vadd.f32 %v969_v53, %v2605_v61 }
 0x1bc   : > { %v1233_v30 = vstv %s2656_s24  ;;  %v1000_v25 = vadd.f32 %v998_v23, %v996_v54 }
 0x1bd   : > { %v1019_v56 = vmul.f32 %v1017_v17, %v840_v32  ;;  %v1049_v35 = vmul.f32 %v1047_v60, %v840_v32  ;;  %v1079_v45 = vmul.f32 %v1077_v50, %v840_v32  ;;  %v1109_v16 = vmul.f32 %v1107_v34, %v840_v32 }
 0x1be   : > { %v1139_v6 = vmul.f32 %v1137_v49, %v840_v32  ;;  %v1169_v14 = vmul.f32 %v1167_v47, %v840_v32  ;;  %v1199_v52 = vmul.f32 %v1197_v57, %v840_v32  ;;  %v1229_v0 = vmul.f32 %v1227_v29, %v840_v32 }
 0x1bf   : > { %v1021_v61 = vadd.f32 %v1019_v56, %v2592_v37  ;;  %v1051_v53 = vadd.f32 %v1049_v35, %v2595_v7  ;;  %v1081_v2 = vadd.f32 %v1079_v45, %v2598_v63  ;;  %v1111_v17 = vadd.f32 %v1109_v16, %v2601_v42 }
 0x1c0   : > { %v1141_v60 = vadd.f32 %v1139_v6, %v2610_v12  ;;  %v1171_v24 = vadd.f32 %v1169_v14, %v2612_v11  ;;  %v1201_v50 = vadd.f32 %v1199_v52, %v2616_v9  ;;  %v1231_v34 = vadd.f32 %v1229_v0, %v2618_v31  ;;  %v990_v29 = vpop.permute.xlu0 %989 }
 0x1c1   : > { %v1025_v49 = vmul.f32 %v1023_v19, %v1000_v25  ;;  %v1055_v47 = vmul.f32 %v1053_v10, %v1000_v25  ;;  %v1085_v37 = vmul.f32 %v1083_v20, %v1000_v25  ;;  %v1115_v7 = vmul.f32 %v1113_v55, %v1000_v25 }
 0x1c2   : > { %v1145_v63 = vmul.f32 %v1143_v48, %v1000_v25  ;;  %v1175_v42 = vmul.f32 %v1173_v8, %v1000_v25  ;;  %v1205_v57 = vmul.f32 %v1203_v5, %v1000_v25  ;;  %v1235_v12 = vmul.f32 %v1233_v30, %v1000_v25 }
 0x1c3   : > { %v1027_v11 = vadd.f32 %v1025_v49, %v1021_v61  ;;  %v1057_v9 = vadd.f32 %v1055_v47, %v1051_v53  ;;  %v1087_v31 = vadd.f32 %v1085_v37, %v1081_v2  ;;  %v1117_v13 = vadd.f32 %v1115_v7, %v1111_v17 }
 0x1c4   : > { %v1147_v43 = vadd.f32 %v1145_v63, %v1141_v60  ;;  %v1177_v62 = vadd.f32 %v1175_v42, %v1171_v24  ;;  %v1207_v44 = vadd.f32 %v1205_v57, %v1201_v50  ;;  %v1237_v36 = vadd.f32 %v1235_v12, %v1231_v34 }
 0x1c5   : > { %1030 = vst.msk [vmem:[%s2712_s13 + $0x8] sm:$0xff] %vm1028_vm5, %v1027_v11  ;;  %v995_v1 = vadd.f32 %v990_v29, %v974_v41 }
 0x1c6   : > { %1435 = vst.msk [vmem:[%s2712_s13 + $0x18] sm:$0xff] %vm1028_vm5, %v1057_v9 }
 0x1c7   : > { %1442 = vst.msk [vmem:[%s2712_s13 + $0x28] sm:$0xff] %vm1028_vm5, %v1087_v31  ;;  %v999_v28 = vadd.f32 %v998_v23, %v995_v1 }
 0x1c8   : > { %1449 = vst.msk [vmem:[%s2712_s13 + $0x38] sm:$0xff] %vm1028_vm5, %v1117_v13 }
 0x1c9   : > { %1456 = vst.msk [vmem:[%s2712_s13 + $0x48] sm:$0xff] %vm1028_vm5, %v1147_v43  ;;  %v1024_v58 = vmul.f32 %v1023_v19, %v999_v28  ;;  %v1054_v59 = vmul.f32 %v1053_v10, %v999_v28  ;;  %v1084_v3 = vmul.f32 %v1083_v20, %v999_v28  ;;  %v1114_v26 = vmul.f32 %v1113_v55, %v999_v28 }
 0x1ca   : > { %1463 = vst.msk [vmem:[%s2712_s13 + $0x58] sm:$0xff] %vm1028_vm5, %v1177_v62  ;;  %v1144_v38 = vmul.f32 %v1143_v48, %v999_v28  ;;  %v1174_v23 = vmul.f32 %v1173_v8, %v999_v28  ;;  %v1204_v22 = vmul.f32 %v1203_v5, %v999_v28  ;;  %v1234_v51 = vmul.f32 %v1233_v30, %v999_v28 }
 0x1cb   : > { %1470 = vst.msk [vmem:[%s2712_s13 + $0x68] sm:$0xff] %vm1028_vm5, %v1207_v44  ;;  %v1026_v19 = vadd.f32 %v1024_v58, %v2664_v18  ;;  %v1056_v10 = vadd.f32 %v1054_v59, %v2667_v40  ;;  %v1086_v20 = vadd.f32 %v1084_v3, %v2670_v46  ;;  %v1116_v55 = vadd.f32 %v1114_v26, %v2673_v21 }
 0x1cc   : > { %1477 = vst.msk [vmem:[%s2712_s13 + $0x78] sm:$0xff] %vm1028_vm5, %v1237_v36  ;;  %v1146_v48 = vadd.f32 %v1144_v38, %v2676_v39  ;;  %v1176_v15 = vadd.f32 %v1174_v23, %v2679_v4  ;;  %v1206_v54 = vadd.f32 %v1204_v22, %v2683_v27  ;;  %v1236_v18 = vadd.f32 %v1234_v51, %v2686_v33 }
 0x1cd   : > { %1029 = vst.msk [vmem:[%s2712_s13] sm:$0xff] %vm1028_vm5, %v1026_v19 }
 0x1ce   : > { %1434 = vst.msk [vmem:[%s2712_s13 + $0x10] sm:$0xff] %vm1028_vm5, %v1056_v10 }
 0x1cf   : > { %1441 = vst.msk [vmem:[%s2712_s13 + $0x20] sm:$0xff] %vm1028_vm5, %v1086_v20 }
 0x1d0   : > { %1448 = vst.msk [vmem:[%s2712_s13 + $0x30] sm:$0xff] %vm1028_vm5, %v1116_v55 }
 0x1d1   : > { %1455 = vst.msk [vmem:[%s2712_s13 + $0x40] sm:$0xff] %vm1028_vm5, %v1146_v48 }
 0x1d2   : > { %1462 = vst.msk [vmem:[%s2712_s13 + $0x50] sm:$0xff] %vm1028_vm5, %v1176_v15 }
 0x1d3   : > { %1469 = vst.msk [vmem:[%s2712_s13 + $0x60] sm:$0xff] %vm1028_vm5, %v1206_v54 }
 0x1d4   : > { %1476 = vst.msk [vmem:[%s2712_s13 + $0x70] sm:$0xff] %vm1028_vm5, %v1236_v18 }
 0x1d5   : > { %1697 = shalt.err (!%p1694_p11)
}
 0x1d6   : > { %s1760_s12 = smov 128   ;;  %s1761_s25 = smov 8  }
 0x1d7   : > { %1503 = dma.vmem_to_hbm [thread:$0]  (%p1867_p5), %s1255_s7, 2048, %s1257_s9, %s1242_s0, %s1760_s12, %s1760_s12, %s1761_s25  }
 0x1d8 PF: > { %s2854_s28 = sld [smem:[#allocation21_spill]]  ;;  %s1271_s11 = sand.u32 1, %s1736_s18  }
 0x1d9   : > { %s1272_s27 = scalar_lea.sflag [#allocation5], %s1271_s11 }
 0x1de   : > { %p2855_p12 = scmp.ge.s32.totalorder %s2854_s28, 2 }
 0x1e0   : > { %p1523_p13 = pnand %p2855_p12, %p1827_p6 }
 0x1e2   : > { %p1524_p0 = pneg %p1523_p13 }
 0x1e4   : > { %1731 = dma.done.wait (%p1524_p0), %s1272_s27, 2048  }
 0x1e5   : > { %1733 = vsyncadd (%p1524_p0), %s1272_s27, 4294965248  ;;  %s2856_s21 = sld [smem:[#allocation23_spill]] }
 0x1e6   : > { %s2857_s18 = sld [smem:[#allocation19_spill]] }
 0x1e7   : > { %s2858_s19 = sld [smem:[#allocation20_spill]] }
 0x1e8   : > { %s2859_s20 = sld [smem:[#allocation24_spill]] }
 0x1eb   : > { %p21_p3 = scmp.ge.s32.totalorder %s2856_s21, 4  }
 0x1ed   :  { %23 = sbr.rel (!%p21_p3) target bundleno = 14 (0xe), region = 112 }
 0x1f2   :  { %1278 = vsyncpa [#allocation4], 1 }
 0x1f3   :  { %1280 = vsyncpa [#allocation4 + $0x1], 1 }
 0x1f4   :  { %1281 = vsyncpa [#allocation5], 1 }
 0x1f5   :  { %1283 = vsyncpa [#allocation5 + $0x1], 1 }
 0x1f6   :  { %1284 = vsyncpa [#allocation6], 1 }
 0x1f7   :  { %1286 = vsyncpa [#allocation6 + $0x1], 1 }
 0x1f8   :  { %1287 = vsyncpa [#allocation9], 1 }
 0x1f9   :  { %1288 = vsyncpa [#allocation12], 1 }

</bundles_post_ra>
